<compile_context>
chip_gen: v7x
topology: tpu7x:2x2x1
jax: 0.10.0
libtpu: 0.0.40
codegen_flags: <defaults>
</compile_context>

<pallas_src>
import functools

import numpy as np
import jax
import jax.numpy as jnp
from jax.experimental import pallas as pl
from jax.experimental.pallas import tpu as pltpu


_COLS_TILE = 2048          # max lane extent of one output tile (multiple of 128)


def _round_up(x, m):
    return (x + m - 1) // m * m


def _vmem_limit():
    """Generation-aware VMEM limit (3/4 of physical, capped for safety)."""
    try:
        cap = pltpu.get_tpu_info().vmem_capacity_bytes
    except Exception:
        cap = 64 * 1024 * 1024
    return int(min(cap * 3 // 4, 96 * 1024 * 1024))


# ---------------------------------------------------------------------------
# Kernels
# ---------------------------------------------------------------------------
def _conv_fused_kernel(x_ref, w_ref, b_ref, o_ref, *, offs, tc, relu,
                       col_axis, n_col_tiles):
    """One (image, Cout-tile, col-tile) grid point of a stride-1 KxK conv.

    x_ref : (1, Cin_p, L)       bf16  flattened padded image (lane = spatial)
    w_ref : (cb, T*Cin_p)       bf16  tap-concatenated weights for this tile
    b_ref : (cb, 1)             f32
    o_ref : (1, cb, tc)               lane-dense (channels x flat spatial tile)
    """
    if n_col_tiles > 1:
        base = pl.multiple_of(pl.program_id(col_axis) * tc, 128)
        slabs = [x_ref[0, :, pl.ds(base + off, tc)] for off in offs]
    else:
        slabs = [x_ref[0, :, pl.ds(off, tc)] for off in offs]
    x_taps = jnp.concatenate(slabs, axis=0)                 # (T*Cin_p, tc)
    acc = jnp.dot(w_ref[...], x_taps,
                  preferred_element_type=jnp.float32)       # one big-K MXU pass
    acc = acc + b_ref[...]
    if relu:
        acc = jnp.maximum(acc, 0.0)
    o_ref[0] = acc.astype(o_ref.dtype)


def _head_fused_kernel(x_ref, w1_ref, b1_ref, w2_ref, b2_ref, o_ref, *,
                       offs, tc, n_col_tiles):
    """Fused classifier head: 3x3 conv + bias + ReLU, then 1x1 conv + bias.

    The intermediate activation `h` never leaves VMEM.
    """
    if n_col_tiles > 1:
        base = pl.multiple_of(pl.program_id(1) * tc, 128)
        slabs = [x_ref[0, :, pl.ds(base + off, tc)] for off in offs]
    else:
        slabs = [x_ref[0, :, pl.ds(off, tc)] for off in offs]
    x_taps = jnp.concatenate(slabs, axis=0)                 # (T*Cin_p, tc)
    h = jnp.dot(w1_ref[...], x_taps, preferred_element_type=jnp.float32)
    h = jnp.maximum(h + b1_ref[...], 0.0).astype(jnp.bfloat16)   # (f2_p, tc)
    logits = jnp.dot(w2_ref[...], h,
                     preferred_element_type=jnp.float32) + b2_ref[...]
    o_ref[0] = logits.astype(o_ref.dtype)


def _bilinear_kernel(x_ref, wh_ref, wwt_ref, o_ref, *, c, hin, win, hout, wout):
    """Separable bilinear upsample, all channels of one image per grid step."""
    x = x_ref[0]                                            # (C, Hin, Win) bf16
    y = jnp.dot(x.reshape(c * hin, win), wwt_ref[...],
                preferred_element_type=jnp.float32)         # (C*Hin, Wout)
    y = y.reshape(c, hin, wout).astype(jnp.bfloat16)
    wh_b = jnp.broadcast_to(wh_ref[...], (c, hout, hin))    # bf16, hoisted once
    z = jnp.einsum("coh,chw->cow", wh_b, y,
                   preferred_element_type=jnp.float32)      # (C, Hout, Wout)
    o_ref[0] = z.astype(o_ref.dtype)


# ---------------------------------------------------------------------------
# Weight / input preparation (init-time and cheap fused XLA glue only)
# ---------------------------------------------------------------------------
def _space_to_depth(x, s):
    """(N, C, H, W) -> (N, C*s*s, H//s, W//s); channel = c*s*s + di*s + dj."""
    n, c, h, w = x.shape
    x = x.reshape(n, c, h // s, s, w // s, s)
    x = x.transpose(0, 1, 3, 5, 2, 4)
    return x.reshape(n, c * s * s, h // s, w // s)


def _weight_to_s2d(w, s):
    """Stride-s (Cout,Cin,kh,kw) conv -> equivalent stride-1 conv weights on
    the space-to-depth input: (Cout, Cin*s*s, ceil(kh/s), ceil(kw/s))."""
    cout, cin, kh, kw = w.shape
    khn, kwn = -(-kh // s), -(-kw // s)
    wq = np.zeros((cout, cin, s, s, khn, kwn), np.float32)
    for ki in range(kh):
        for kj in range(kw):
            wq[:, :, ki % s, kj % s, ki // s, kj // s] = w[:, :, ki, kj]
    return wq.reshape(cout, cin * s * s, khn, kwn)


def prep_conv(w, b, *, stride=1, cin_pad_to=None):
    """Init-time weight prep: bf16 (Cout_p, T*Cin_p) tap-concatenated slab."""
    w = np.asarray(w, np.float32)
    cout, cin, kh, kw = w.shape
    w_eff = _weight_to_s2d(w, stride) if stride > 1 else w
    _, cin_eff, kh_eff, kw_eff = w_eff.shape
    cin_p = cin_pad_to if cin_pad_to is not None else _round_up(cin_eff, 8)
    cout_p = _round_up(cout, 8)
    if cout_p > 256:                      # pad so 256-wide Cout tiles divide
        cout_p = _round_up(cout, 256)
    cb = min(cout_p, 256)                 # fills the 256x256 MXU on v6e/v7x
    t = kh_eff * kw_eff
    wpad = np.zeros((cout_p, cin_p, kh_eff, kw_eff), np.float32)
    wpad[:cout, :cin_eff] = w_eff
    # (Cout_p, Cin_p, kh, kw) -> (Cout_p, T*Cin_p), tap-major / cin-minor
    wflat = np.transpose(wpad, (0, 2, 3, 1)).reshape(cout_p, t * cin_p)
    bpad = np.zeros((cout_p, 1), np.float32)
    bpad[:cout, 0] = np.asarray(b, np.float32)
    return dict(
        wflat=jnp.asarray(wflat, jnp.bfloat16), b=jnp.asarray(bpad),
        kh=kh, kw=kw, kh_eff=kh_eff, kw_eff=kw_eff, stride=stride,
        cout=cout, cout_p=cout_p, cb=cb, cin_p=cin_p)


def _flatten_padded(x, conv, pad):
    """Spatial pad (+ s2d for strided convs) + flatten to a lane-dense
    (N, Cin_p, L) bf16 slab with 128-padded spatial columns."""
    n, _, h, w = x.shape
    s, kh, kw = conv["stride"], conv["kh"], conv["kw"]
    ho = (h + 2 * pad - kh) // s + 1
    wo = (w + 2 * pad - kw) // s + 1
    xp = jnp.pad(x, ((0, 0), (0, 0), (pad, pad), (pad, pad)))
    if s > 1:
        eh = (-xp.shape[2]) % s
        ew = (-xp.shape[3]) % s
        if eh or ew:
            xp = jnp.pad(xp, ((0, 0), (0, 0), (0, eh), (0, ew)))
        xp = _space_to_depth(xp, s)
    _, cin_eff, hp, wp = xp.shape
    cin_p = conv["cin_p"]
    assert cin_p >= cin_eff
    offs = [ki * wp + kj
            for ki in range(conv["kh_eff"]) for kj in range(conv["kw_eff"])]
    out_cols = (ho - 1) * wp + wo
    padded_cols = _round_up(out_cols, 128)            # unmasked lane-dense stores
    if padded_cols > _COLS_TILE:
        padded_cols = _round_up(out_cols, _COLS_TILE)
        tc = _COLS_TILE
    else:
        tc = padded_cols
    L = _round_up(max(padded_cols + max(offs), hp * wp), 128)
    x_flat = xp.reshape(n, cin_eff, hp * wp).astype(jnp.bfloat16)
    x_flat = jnp.pad(x_flat, ((0, 0), (0, cin_p - cin_eff), (0, L - hp * wp)))
    geom = dict(ho=ho, wo=wo, wp=wp, out_cols=out_cols,
                padded_cols=padded_cols, tc=tc)
    return x_flat, offs, geom


def _unflatten(out_flat, conv, geom):
    """(N, Cout_p, padded_cols) -> (N, Cout, Ho, Wo): drop pad/wrap columns."""
    ho, wo, wp, out_cols = geom["ho"], geom["wo"], geom["wp"], geom["out_cols"]
    n = out_flat.shape[0]
    of = out_flat[:, :conv["cout"], :out_cols]
    of = jnp.pad(of, ((0, 0), (0, 0), (0, ho * wp - out_cols)))
    return of.reshape(n, conv["cout"], ho, wp)[:, :, :, :wo]


# ---------------------------------------------------------------------------
# Conv2d (+ bias + ReLU) — fused kernel, grid over (batch, Cout tiles, col tiles)
# ---------------------------------------------------------------------------
def conv2d(x, conv, *, pad, relu=True, out_dtype=jnp.bfloat16):
    n = x.shape[0]
    x_flat, offs, geom = _flatten_padded(x, conv, pad)
    cin_p, L = x_flat.shape[1], x_flat.shape[2]
    cout_p, cb = conv["cout_p"], conv["cb"]
    k = conv["wflat"].shape[1]
    tc, padded_cols = geom["tc"], geom["padded_cols"]
    n_cj = padded_cols // tc

    flops = 2 * n * cout_p * k * padded_cols
    bytes_acc = (x_flat.size * 2 + n * conv["wflat"].size * 2
                 + n * cout_p * padded_cols * np.dtype(out_dtype).itemsize)

    kern = functools.partial(_conv_fused_kernel, offs=offs, tc=tc, relu=relu,
                             col_axis=2, n_col_tiles=n_cj)
    out_flat = pl.pallas_call(
        kern,
        out_shape=jax.ShapeDtypeStruct((n, cout_p, padded_cols), out_dtype),
        grid=(n, cout_p // cb, n_cj),
        in_specs=[
            pl.BlockSpec((1, cin_p, L), lambda ni, ci, cj: (ni, 0, 0)),
            pl.BlockSpec((cb, k), lambda ni, ci, cj: (ci, 0)),
            pl.BlockSpec((cb, 1), lambda ni, ci, cj: (ci, 0)),
        ],
        out_specs=pl.BlockSpec((1, cb, tc), lambda ni, ci, cj: (ni, ci, cj)),
        compiler_params=pltpu.CompilerParams(
            dimension_semantics=("parallel", "parallel", "parallel"),
            vmem_limit_bytes=_vmem_limit()),
        cost_estimate=pl.CostEstimate(flops=flops, transcendentals=0,
                                      bytes_accessed=bytes_acc),
    )(x_flat, conv["wflat"], conv["b"])
    return _unflatten(out_flat, conv, geom)


# ---------------------------------------------------------------------------
# Classifier head: fused (3x3 conv + ReLU) -> (1x1 conv), grid (batch, col tiles)
# ---------------------------------------------------------------------------
def classifier_head(x, conv1, conv2, *, pad, out_dtype=jnp.bfloat16):
    n = x.shape[0]
    x_flat, offs, geom = _flatten_padded(x, conv1, pad)
    cin_p, L = x_flat.shape[1], x_flat.shape[2]
    f2_p = conv1["cout_p"]
    ncls_p = conv2["cout_p"]
    k1 = conv1["wflat"].shape[1]
    assert conv2["wflat"].shape[1] == f2_p, "1x1 conv cin must match conv1 cout_p"
    tc, padded_cols = geom["tc"], geom["padded_cols"]
    n_cj = padded_cols // tc

    flops = 2 * n * padded_cols * (f2_p * k1 + ncls_p * f2_p)
    bytes_acc = (x_flat.size * 2
                 + n * (conv1["wflat"].size + conv2["wflat"].size) * 2
                 + n * ncls_p * padded_cols * np.dtype(out_dtype).itemsize)

    kern = functools.partial(_head_fused_kernel, offs=offs, tc=tc,
                             n_col_tiles=n_cj)
    out_flat = pl.pallas_call(
        kern,
        out_shape=jax.ShapeDtypeStruct((n, ncls_p, padded_cols), out_dtype),
        grid=(n, n_cj),
        in_specs=[
            pl.BlockSpec((1, cin_p, L), lambda ni, cj: (ni, 0, 0)),
            pl.BlockSpec((f2_p, k1), lambda ni, cj: (0, 0)),
            pl.BlockSpec((f2_p, 1), lambda ni, cj: (0, 0)),
            pl.BlockSpec((ncls_p, f2_p), lambda ni, cj: (0, 0)),
            pl.BlockSpec((ncls_p, 1), lambda ni, cj: (0, 0)),
        ],
        out_specs=pl.BlockSpec((1, ncls_p, tc), lambda ni, cj: (ni, 0, cj)),
        compiler_params=pltpu.CompilerParams(
            dimension_semantics=("parallel", "parallel"),
            vmem_limit_bytes=_vmem_limit()),
        cost_estimate=pl.CostEstimate(flops=flops, transcendentals=0,
                                      bytes_accessed=bytes_acc),
    )(x_flat, conv1["wflat"], conv1["b"], conv2["wflat"], conv2["b"])
    return _unflatten(out_flat, conv2, geom)


# ---------------------------------------------------------------------------
# Bilinear upsample (align_corners=False) — channel-batched, bf16 MXU operands
# ---------------------------------------------------------------------------
def _bilinear_matrix(out_size, in_size):
    """Row-stochastic (out, in) matrix matching F.interpolate bilinear,
    align_corners=False, along one axis (numpy, trace-time)."""
    if out_size == in_size:
        return np.eye(out_size, dtype=np.float32)
    scale = in_size / out_size
    i = np.arange(out_size, dtype=np.float64)
    src = np.maximum((i + 0.5) * scale - 0.5, 0.0)   # PyTorch clamps negatives
    i0 = np.minimum(np.floor(src).astype(np.int64), in_size - 1)
    i1 = np.minimum(i0 + 1, in_size - 1)
    frac = src - i0
    m = np.zeros((out_size, in_size), np.float32)
    m[np.arange(out_size), i0] += 1.0 - frac
    m[np.arange(out_size), i1] += frac
    return m


def bilinear_upsample(x, out_hw):
    """x: (N, C, Hin, Win) bf16/f32 -> (N, C, Hout, Wout) f32."""
    n, c, hin, win = x.shape
    hout, wout = out_hw
    wh = jnp.asarray(_bilinear_matrix(hout, hin), jnp.bfloat16)       # (Ho, Hi)
    wwt = jnp.asarray(_bilinear_matrix(wout, win).T, jnp.bfloat16)    # (Wi, Wo)

    flops = 2 * n * c * (hin * win * wout + hout * hin * wout)
    bytes_acc = n * c * hin * win * 2 + (hout * hin + win * wout) * 2 \
        + n * c * hout * wout * 4

    kern = functools.partial(_bilinear_kernel, c=c, hin=hin, win=win,
                             hout=hout, wout=wout)
    return pl.pallas_call(
        kern,
        out_shape=jax.ShapeDtypeStruct((n, c, hout, wout), jnp.float32),
        grid=(n,),
        in_specs=[
            pl.BlockSpec((1, c, hin, win), lambda ni: (ni, 0, 0, 0)),
            pl.BlockSpec((hout, hin), lambda ni: (0, 0)),
            pl.BlockSpec((win, wout), lambda ni: (0, 0)),
        ],
        out_specs=pl.BlockSpec((1, c, hout, wout), lambda ni: (ni, 0, 0, 0)),
        compiler_params=pltpu.CompilerParams(
            dimension_semantics=("parallel",),
            vmem_limit_bytes=_vmem_limit()),
        cost_estimate=pl.CostEstimate(flops=flops, transcendentals=0,
                                      bytes_accessed=bytes_acc),
    )(x.astype(jnp.bfloat16), wh, wwt)


# ---------------------------------------------------------------------------
# DeepLabV3: backbone -> classifier -> upsample to input spatial size
# ---------------------------------------------------------------------------
def init_params(key, cin, f1, f2, num_classes):
    ks = jax.random.split(key, 4)

    def wi(k, shape, fan_in):
        return np.asarray(jax.random.normal(k, shape, jnp.float32)) / np.sqrt(fan_in)

    z = lambda m: np.zeros((m,), np.float32)
    # backbone: two 3x3 stride-2 convs (output stride 4)
    b1 = prep_conv(wi(ks[0], (f1, cin, 3, 3), cin * 9), z(f1), stride=2)
    b2 = prep_conv(wi(ks[1], (f2, f1, 3, 3), f1 * 9), z(f2), stride=2)
    # classifier: 3x3 conv + ReLU, then 1x1 conv to num_classes (fused)
    c1 = prep_conv(wi(ks[2], (f2, f2, 3, 3), f2 * 9), z(f2), stride=1)
    c2 = prep_conv(wi(ks[3], (num_classes, f2, 1, 1), f2), z(num_classes),
                   stride=1, cin_pad_to=c1["cout_p"])
    return {"b1": b1, "b2": b2, "c1": c1, "c2": c2}


def deeplabv3_forward(params, x):
    input_shape = x.shape[-2:]                       # (H, W)
    # backbone(x) -> (features, other); DeepLabV3.forward uses only `features`
    low = conv2d(x, params["b1"], pad=1, relu=True)
    features = conv2d(low, params["b2"], pad=1, relu=True)
    del low                                          # second output unused
    # classifier(features): fused 3x3+ReLU -> 1x1
    logits = classifier_head(features, params["c1"], params["c2"], pad=1)
    # F.interpolate(x, size=input_shape, mode='bilinear', align_corners=False)
    return bilinear_upsample(logits, input_shape)


if __name__ == "__main__":
    key = jax.random.PRNGKey(0)
    k_param, k_x = jax.random.split(key)

    N, CIN, H, W = 2, 3, 16, 16
    F1, F2, NUM_CLASSES = 16, 32, 8

    params = init_params(k_param, CIN, F1, F2, NUM_CLASSES)
    x = jax.random.normal(k_x, (N, CIN, H, W), jnp.float32)

    # Close over params so the per-conv static metadata (strides, tap offsets,
    # tile sizes) stays Python-static under jit.
    fwd = jax.jit(functools.partial(deeplabv3_forward, params))
    out = jax.block_until_ready(fwd(x))

    assert out.shape == (N, NUM_CLASSES, H, W), out.shape
    assert out.dtype == jnp.float32
    assert bool(jnp.all(jnp.isfinite(out)))
    print("KERNEL_OK")
</pallas_src>

<mosaic_0001>
module attributes {stable_mosaic.version = 11 : i64} {
  func.func @_conv_fused_kernel(%arg0: i32, %arg1: i32, %arg2: i32, %arg3: memref<1x16x256xbf16, #tpu.memory_space<vmem>>, %arg4: memref<16x64xbf16, #tpu.memory_space<vmem>>, %arg5: memref<16x1xf32, #tpu.memory_space<vmem>>, %arg6: memref<1x16x128xbf16, #tpu.memory_space<vmem>>) attributes {dimension_semantics = [#tpu.dimension_semantics<parallel>, #tpu.dimension_semantics<parallel>, #tpu.dimension_semantics<parallel>], iteration_bounds = array<i64: 2, 1, 1>, scalar_prefetch = 0 : i64, scratch_operands = 0 : i64, tpu.core_type = #tpu.core_type<tc>, window_params = [{transform_indices = @transform_0, window_bounds = array<i64: 1, 16, 256>}, {transform_indices = @transform_1, window_bounds = array<i64: 16, 64>}, {transform_indices = @transform_2, window_bounds = array<i64: 16, 1>}, {transform_indices = @transform_3, window_bounds = array<i64: 1, 16, 128>}]} {
    %c0 = arith.constant 0 : index
    %c0_0 = arith.constant 0 : index
    %c0_1 = arith.constant 0 : index
    %0 = vector.load %arg3[%c0, %c0_0, %c0_1] : memref<1x16x256xbf16, #tpu.memory_space<vmem>>, vector<1x16x128xbf16>
    %1 = vector.shape_cast %0 : vector<1x16x128xbf16> to vector<16x128xbf16>
    %c0_2 = arith.constant 0 : index
    %c0_3 = arith.constant 0 : index
    %c1 = arith.constant 1 : index
    %2 = vector.load %arg3[%c0_2, %c0_3, %c1] : memref<1x16x256xbf16, #tpu.memory_space<vmem>>, vector<1x16x128xbf16>
    %3 = vector.shape_cast %2 : vector<1x16x128xbf16> to vector<16x128xbf16>
    %c0_4 = arith.constant 0 : index
    %c0_5 = arith.constant 0 : index
    %c9 = arith.constant 9 : index
    %4 = vector.load %arg3[%c0_4, %c0_5, %c9] : memref<1x16x256xbf16, #tpu.memory_space<vmem>>, vector<1x16x128xbf16>
    %5 = vector.shape_cast %4 : vector<1x16x128xbf16> to vector<16x128xbf16>
    %c0_6 = arith.constant 0 : index
    %c0_7 = arith.constant 0 : index
    %c10 = arith.constant 10 : index
    %6 = vector.load %arg3[%c0_6, %c0_7, %c10] : memref<1x16x256xbf16, #tpu.memory_space<vmem>>, vector<1x16x128xbf16>
    %7 = vector.shape_cast %6 : vector<1x16x128xbf16> to vector<16x128xbf16>
    %8 = tpu.concatenate %1, %3, %5, %7 in 0 : vector<16x128xbf16>, vector<16x128xbf16>, vector<16x128xbf16>, vector<16x128xbf16> -> vector<64x128xbf16>
    %c0_8 = arith.constant 0 : index
    %c0_9 = arith.constant 0 : index
    %9 = vector.load %arg4[%c0_8, %c0_9] : memref<16x64xbf16, #tpu.memory_space<vmem>>, vector<16x64xbf16>
    %cst = arith.constant dense<0.000000e+00> : vector<16x128xf32>
    %10 = tpu.matmul %9, %8, %cst {dimension_numbers = #tpu.dot_dimension_numbers<[1], [0], [0], [1], [0, 0, 1, 1], [], []>} : vector<16x64xbf16>, vector<64x128xbf16>, vector<16x128xf32> -> vector<16x128xf32>
    %c0_10 = arith.constant 0 : index
    %c0_11 = arith.constant 0 : index
    %11 = vector.load %arg5[%c0_10, %c0_11] : memref<16x1xf32, #tpu.memory_space<vmem>>, vector<16x1xf32>
    %12 = vector.broadcast %11 : vector<16x1xf32> to vector<16x128xf32>
    %13 = arith.addf %10, %12 : vector<16x128xf32>
    %cst_12 = arith.constant 0.000000e+00 : f32
    %14 = vector.broadcast %cst_12 : f32 to vector<16x128xf32>
    %15 = arith.maximumf %13, %14 : vector<16x128xf32>
    %16 = arith.truncf %15 : vector<16x128xf32> to vector<16x128xbf16>
    %c0_13 = arith.constant 0 : index
    %c0_14 = arith.constant 0 : index
    %c0_15 = arith.constant 0 : index
    %17 = vector.load %arg6[%c0_13, %c0_14, %c0_15] : memref<1x16x128xbf16, #tpu.memory_space<vmem>>, vector<1x16x128xbf16>
    %18 = vector.shape_cast %17 : vector<1x16x128xbf16> to vector<16x128xbf16>
    %19 = vector.shape_cast %16 : vector<16x128xbf16> to vector<1x16x128xbf16>
    tpu.vector_store %arg6[%c0_13, %c0_14, %c0_15], %19 {strides = array<i32>} : memref<1x16x128xbf16, #tpu.memory_space<vmem>>, vector<1x16x128xbf16>,
    return
  }
  func.func @transform_0(%arg0: i32, %arg1: i32, %arg2: i32) -> (i32, i32, i32) {
    %c0_i32 = arith.constant 0 : i32
    %c0_i32_0 = arith.constant 0 : i32
    %c0_i32_1 = arith.constant 0 : i32
    return %arg0, %c0_i32, %c0_i32_0 : i32, i32, i32
  }
  func.func @transform_1(%arg0: i32, %arg1: i32, %arg2: i32) -> (i32, i32) {
    %c0_i32 = arith.constant 0 : i32
    %c0_i32_0 = arith.constant 0 : i32
    return %arg1, %c0_i32 : i32, i32
  }
  func.func @transform_2(%arg0: i32, %arg1: i32, %arg2: i32) -> (i32, i32) {
    %c0_i32 = arith.constant 0 : i32
    %c0_i32_0 = arith.constant 0 : i32
    return %arg1, %c0_i32 : i32, i32
  }
  func.func @transform_3(%arg0: i32, %arg1: i32, %arg2: i32) -> (i32, i32, i32) {
    %c0_i32 = arith.constant 0 : i32
    return %arg0, %arg1, %arg2 : i32, i32, i32
  }
}

module attributes {stable_mosaic.version = 11 : i64} {
  func.func @_conv_fused_kernel(%arg0: i32, %arg1: i32, %arg2: i32, %arg3: memref<1x64x256xbf16, #tpu.memory_space<vmem>>, %arg4: memref<32x256xbf16, #tpu.memory_space<vmem>>, %arg5: memref<32x1xf32, #tpu.memory_space<vmem>>, %arg6: memref<1x32x128xbf16, #tpu.memory_space<vmem>>) attributes {dimension_semantics = [#tpu.dimension_semantics<parallel>, #tpu.dimension_semantics<parallel>, #tpu.dimension_semantics<parallel>], iteration_bounds = array<i64: 2, 1, 1>, scalar_prefetch = 0 : i64, scratch_operands = 0 : i64, tpu.core_type = #tpu.core_type<tc>, window_params = [{transform_indices = @transform_0, window_bounds = array<i64: 1, 64, 256>}, {transform_indices = @transform_1, window_bounds = array<i64: 32, 256>}, {transform_indices = @transform_2, window_bounds = array<i64: 32, 1>}, {transform_indices = @transform_3, window_bounds = array<i64: 1, 32, 128>}]} {
    %c0 = arith.constant 0 : index
    %c0_0 = arith.constant 0 : index
    %c0_1 = arith.constant 0 : index
    %0 = vector.load %arg3[%c0, %c0_0, %c0_1] : memref<1x64x256xbf16, #tpu.memory_space<vmem>>, vector<1x64x128xbf16>
    %1 = vector.shape_cast %0 : vector<1x64x128xbf16> to vector<64x128xbf16>
    %c0_2 = arith.constant 0 : index
    %c0_3 = arith.constant 0 : index
    %c1 = arith.constant 1 : index
    %2 = vector.load %arg3[%c0_2, %c0_3, %c1] : memref<1x64x256xbf16, #tpu.memory_space<vmem>>, vector<1x64x128xbf16>
    %3 = vector.shape_cast %2 : vector<1x64x128xbf16> to vector<64x128xbf16>
    %c0_4 = arith.constant 0 : index
    %c0_5 = arith.constant 0 : index
    %c5 = arith.constant 5 : index
    %4 = vector.load %arg3[%c0_4, %c0_5, %c5] : memref<1x64x256xbf16, #tpu.memory_space<vmem>>, vector<1x64x128xbf16>
    %5 = vector.shape_cast %4 : vector<1x64x128xbf16> to vector<64x128xbf16>
    %c0_6 = arith.constant 0 : index
    %c0_7 = arith.constant 0 : index
    %c6 = arith.constant 6 : index
    %6 = vector.load %arg3[%c0_6, %c0_7, %c6] : memref<1x64x256xbf16, #tpu.memory_space<vmem>>, vector<1x64x128xbf16>
    %7 = vector.shape_cast %6 : vector<1x64x128xbf16> to vector<64x128xbf16>
    %8 = tpu.concatenate %1, %3, %5, %7 in 0 : vector<64x128xbf16>, vector<64x128xbf16>, vector<64x128xbf16>, vector<64x128xbf16> -> vector<256x128xbf16>
    %c0_8 = arith.constant 0 : index
    %c0_9 = arith.constant 0 : index
    %9 = vector.load %arg4[%c0_8, %c0_9] : memref<32x256xbf16, #tpu.memory_space<vmem>>, vector<32x256xbf16>
    %cst = arith.constant dense<0.000000e+00> : vector<32x128xf32>
    %10 = tpu.matmul %9, %8, %cst {dimension_numbers = #tpu.dot_dimension_numbers<[1], [0], [0], [1], [0, 0, 1, 1], [], []>} : vector<32x256xbf16>, vector<256x128xbf16>, vector<32x128xf32> -> vector<32x128xf32>
    %c0_10 = arith.constant 0 : index
    %c0_11 = arith.constant 0 : index
    %11 = vector.load %arg5[%c0_10, %c0_11] : memref<32x1xf32, #tpu.memory_space<vmem>>, vector<32x1xf32>
    %12 = vector.broadcast %11 : vector<32x1xf32> to vector<32x128xf32>
    %13 = arith.addf %10, %12 : vector<32x128xf32>
    %cst_12 = arith.constant 0.000000e+00 : f32
    %14 = vector.broadcast %cst_12 : f32 to vector<32x128xf32>
    %15 = arith.maximumf %13, %14 : vector<32x128xf32>
    %16 = arith.truncf %15 : vector<32x128xf32> to vector<32x128xbf16>
    %c0_13 = arith.constant 0 : index
    %c0_14 = arith.constant 0 : index
    %c0_15 = arith.constant 0 : index
    %17 = vector.load %arg6[%c0_13, %c0_14, %c0_15] : memref<1x32x128xbf16, #tpu.memory_space<vmem>>, vector<1x32x128xbf16>
    %18 = vector.shape_cast %17 : vector<1x32x128xbf16> to vector<32x128xbf16>
    %19 = vector.shape_cast %16 : vector<32x128xbf16> to vector<1x32x128xbf16>
    tpu.vector_store %arg6[%c0_13, %c0_14, %c0_15], %19 {strides = array<i32>} : memref<1x32x128xbf16, #tpu.memory_space<vmem>>, vector<1x32x128xbf16>,
    return
  }
  func.func @transform_0(%arg0: i32, %arg1: i32, %arg2: i32) -> (i32, i32, i32) {
    %c0_i32 = arith.constant 0 : i32
    %c0_i32_0 = arith.constant 0 : i32
    %c0_i32_1 = arith.constant 0 : i32
    return %arg0, %c0_i32, %c0_i32_0 : i32, i32, i32
  }
  func.func @transform_1(%arg0: i32, %arg1: i32, %arg2: i32) -> (i32, i32) {
    %c0_i32 = arith.constant 0 : i32
    %c0_i32_0 = arith.constant 0 : i32
    return %arg1, %c0_i32 : i32, i32
  }
  func.func @transform_2(%arg0: i32, %arg1: i32, %arg2: i32) -> (i32, i32) {
    %c0_i32 = arith.constant 0 : i32
    %c0_i32_0 = arith.constant 0 : i32
    return %arg1, %c0_i32 : i32, i32
  }
  func.func @transform_3(%arg0: i32, %arg1: i32, %arg2: i32) -> (i32, i32, i32) {
    %c0_i32 = arith.constant 0 : i32
    return %arg0, %arg1, %arg2 : i32, i32, i32
  }
}

module attributes {stable_mosaic.version = 11 : i64} {
  func.func @_head_fused_kernel(%arg0: i32, %arg1: i32, %arg2: memref<1x32x256xbf16, #tpu.memory_space<vmem>>, %arg3: memref<32x288xbf16, #tpu.memory_space<vmem>>, %arg4: memref<32x1xf32, #tpu.memory_space<vmem>>, %arg5: memref<8x32xbf16, #tpu.memory_space<vmem>>, %arg6: memref<8x1xf32, #tpu.memory_space<vmem>>, %arg7: memref<1x8x128xbf16, #tpu.memory_space<vmem>>) attributes {dimension_semantics = [#tpu.dimension_semantics<parallel>, #tpu.dimension_semantics<parallel>], iteration_bounds = array<i64: 2, 1>, scalar_prefetch = 0 : i64, scratch_operands = 0 : i64, tpu.core_type = #tpu.core_type<tc>, window_params = [{transform_indices = @transform_0, window_bounds = array<i64: 1, 32, 256>}, {pipeline_mode = #tpu.pipeline_mode<synchronous>, transform_indices = @transform_1, window_bounds = array<i64: 32, 288>}, {pipeline_mode = #tpu.pipeline_mode<synchronous>, transform_indices = @transform_2, window_bounds = array<i64: 32, 1>}, {pipeline_mode = #tpu.pipeline_mode<synchronous>, transform_indices = @transform_3, window_bounds = array<i64: 8, 32>}, {pipeline_mode = #tpu.pipeline_mode<synchronous>, transform_indices = @transform_4, window_bounds = array<i64: 8, 1>}, {transform_indices = @transform_5, window_bounds = array<i64: 1, 8, 128>}]} {
    %c0 = arith.constant 0 : index
    %c0_0 = arith.constant 0 : index
    %c0_1 = arith.constant 0 : index
    %0 = vector.load %arg2[%c0, %c0_0, %c0_1] : memref<1x32x256xbf16, #tpu.memory_space<vmem>>, vector<1x32x128xbf16>
    %1 = vector.shape_cast %0 : vector<1x32x128xbf16> to vector<32x128xbf16>
    %c0_2 = arith.constant 0 : index
    %c0_3 = arith.constant 0 : index
    %c1 = arith.constant 1 : index
    %2 = vector.load %arg2[%c0_2, %c0_3, %c1] : memref<1x32x256xbf16, #tpu.memory_space<vmem>>, vector<1x32x128xbf16>
    %3 = vector.shape_cast %2 : vector<1x32x128xbf16> to vector<32x128xbf16>
    %c0_4 = arith.constant 0 : index
    %c0_5 = arith.constant 0 : index
    %c2 = arith.constant 2 : index
    %4 = vector.load %arg2[%c0_4, %c0_5, %c2] : memref<1x32x256xbf16, #tpu.memory_space<vmem>>, vector<1x32x128xbf16>
    %5 = vector.shape_cast %4 : vector<1x32x128xbf16> to vector<32x128xbf16>
    %c0_6 = arith.constant 0 : index
    %c0_7 = arith.constant 0 : index
    %c6 = arith.constant 6 : index
    %6 = vector.load %arg2[%c0_6, %c0_7, %c6] : memref<1x32x256xbf16, #tpu.memory_space<vmem>>, vector<1x32x128xbf16>
    %7 = vector.shape_cast %6 : vector<1x32x128xbf16> to vector<32x128xbf16>
    %c0_8 = arith.constant 0 : index
    %c0_9 = arith.constant 0 : index
    %c7 = arith.constant 7 : index
    %8 = vector.load %arg2[%c0_8, %c0_9, %c7] : memref<1x32x256xbf16, #tpu.memory_space<vmem>>, vector<1x32x128xbf16>
    %9 = vector.shape_cast %8 : vector<1x32x128xbf16> to vector<32x128xbf16>
    %c0_10 = arith.constant 0 : index
    %c0_11 = arith.constant 0 : index
    %c8 = arith.constant 8 : index
    %10 = vector.load %arg2[%c0_10, %c0_11, %c8] : memref<1x32x256xbf16, #tpu.memory_space<vmem>>, vector<1x32x128xbf16>
    %11 = vector.shape_cast %10 : vector<1x32x128xbf16> to vector<32x128xbf16>
    %c0_12 = arith.constant 0 : index
    %c0_13 = arith.constant 0 : index
    %c12 = arith.constant 12 : index
    %12 = vector.load %arg2[%c0_12, %c0_13, %c12] : memref<1x32x256xbf16, #tpu.memory_space<vmem>>, vector<1x32x128xbf16>
    %13 = vector.shape_cast %12 : vector<1x32x128xbf16> to vector<32x128xbf16>
    %c0_14 = arith.constant 0 : index
    %c0_15 = arith.constant 0 : index
    %c13 = arith.constant 13 : index
    %14 = vector.load %arg2[%c0_14, %c0_15, %c13] : memref<1x32x256xbf16, #tpu.memory_space<vmem>>, vector<1x32x128xbf16>
    %15 = vector.shape_cast %14 : vector<1x32x128xbf16> to vector<32x128xbf16>
    %c0_16 = arith.constant 0 : index
    %c0_17 = arith.constant 0 : index
    %c14 = arith.constant 14 : index
    %16 = vector.load %arg2[%c0_16, %c0_17, %c14] : memref<1x32x256xbf16, #tpu.memory_space<vmem>>, vector<1x32x128xbf16>
    %17 = vector.shape_cast %16 : vector<1x32x128xbf16> to vector<32x128xbf16>
    %18 = tpu.concatenate %1, %3, %5, %7, %9, %11, %13, %15, %17 in 0 : vector<32x128xbf16>, vector<32x128xbf16>, vector<32x128xbf16>, vector<32x128xbf16>, vector<32x128xbf16>, vector<32x128xbf16>, vector<32x128xbf16>, vector<32x128xbf16>, vector<32x128xbf16> -> vector<288x128xbf16>
    %c0_18 = arith.constant 0 : index
    %c0_19 = arith.constant 0 : index
    %19 = vector.load %arg3[%c0_18, %c0_19] : memref<32x288xbf16, #tpu.memory_space<vmem>>, vector<32x288xbf16>
    %cst = arith.constant dense<0.000000e+00> : vector<32x128xf32>
    %20 = tpu.matmul %19, %18, %cst {dimension_numbers = #tpu.dot_dimension_numbers<[1], [0], [0], [1], [0, 0, 1, 1], [], []>} : vector<32x288xbf16>, vector<288x128xbf16>, vector<32x128xf32> -> vector<32x128xf32>
    %c0_20 = arith.constant 0 : index
    %c0_21 = arith.constant 0 : index
    %21 = vector.load %arg4[%c0_20, %c0_21] : memref<32x1xf32, #tpu.memory_space<vmem>>, vector<32x1xf32>
    %22 = vector.broadcast %21 : vector<32x1xf32> to vector<32x128xf32>
    %23 = arith.addf %20, %22 : vector<32x128xf32>
    %cst_22 = arith.constant 0.000000e+00 : f32
    %24 = vector.broadcast %cst_22 : f32 to vector<32x128xf32>
    %25 = arith.maximumf %23, %24 : vector<32x128xf32>
    %26 = arith.truncf %25 : vector<32x128xf32> to vector<32x128xbf16>
    %c0_23 = arith.constant 0 : index
    %c0_24 = arith.constant 0 : index
    %27 = vector.load %arg5[%c0_23, %c0_24] : memref<8x32xbf16, #tpu.memory_space<vmem>>, vector<8x32xbf16>
    %cst_25 = arith.constant dense<0.000000e+00> : vector<8x128xf32>
    %28 = tpu.matmul %27, %26, %cst_25 {dimension_numbers = #tpu.dot_dimension_numbers<[1], [0], [0], [1], [0, 0, 1, 1], [], []>} : vector<8x32xbf16>, vector<32x128xbf16>, vector<8x128xf32> -> vector<8x128xf32>
    %c0_26 = arith.constant 0 : index
    %c0_27 = arith.constant 0 : index
    %29 = vector.load %arg6[%c0_26, %c0_27] : memref<8x1xf32, #tpu.memory_space<vmem>>, vector<8x1xf32>
    %30 = vector.broadcast %29 : vector<8x1xf32> to vector<8x128xf32>
    %31 = arith.addf %28, %30 : vector<8x128xf32>
    %32 = arith.truncf %31 : vector<8x128xf32> to vector<8x128xbf16>
    %c0_28 = arith.constant 0 : index
    %c0_29 = arith.constant 0 : index
    %c0_30 = arith.constant 0 : index
    %33 = vector.load %arg7[%c0_28, %c0_29, %c0_30] : memref<1x8x128xbf16, #tpu.memory_space<vmem>>, vector<1x8x128xbf16>
    %34 = vector.shape_cast %33 : vector<1x8x128xbf16> to vector<8x128xbf16>
    %35 = vector.shape_cast %32 : vector<8x128xbf16> to vector<1x8x128xbf16>
    tpu.vector_store %arg7[%c0_28, %c0_29, %c0_30], %35 {strides = array<i32>} : memref<1x8x128xbf16, #tpu.memory_space<vmem>>, vector<1x8x128xbf16>,
    return
  }
  func.func @transform_0(%arg0: i32, %arg1: i32) -> (i32, i32, i32) {
    %c0_i32 = arith.constant 0 : i32
    %c0_i32_0 = arith.constant 0 : i32
    %c0_i32_1 = arith.constant 0 : i32
    return %arg0, %c0_i32, %c0_i32_0 : i32, i32, i32
  }
  func.func @transform_1(%arg0: i32, %arg1: i32) -> (i32, i32) {
    %c0_i32 = arith.constant 0 : i32
    %c0_i32_0 = arith.constant 0 : i32
    %c0_i32_1 = arith.constant 0 : i32
    return %c0_i32, %c0_i32_0 : i32, i32
  }
  func.func @transform_2(%arg0: i32, %arg1: i32) -> (i32, i32) {
    %c0_i32 = arith.constant 0 : i32
    %c0_i32_0 = arith.constant 0 : i32
    %c0_i32_1 = arith.constant 0 : i32
    return %c0_i32, %c0_i32_0 : i32, i32
  }
  func.func @transform_3(%arg0: i32, %arg1: i32) -> (i32, i32) {
    %c0_i32 = arith.constant 0 : i32
    %c0_i32_0 = arith.constant 0 : i32
    %c0_i32_1 = arith.constant 0 : i32
    return %c0_i32, %c0_i32_0 : i32, i32
  }
  func.func @transform_4(%arg0: i32, %arg1: i32) -> (i32, i32) {
    %c0_i32 = arith.constant 0 : i32
    %c0_i32_0 = arith.constant 0 : i32
    %c0_i32_1 = arith.constant 0 : i32
    return %c0_i32, %c0_i32_0 : i32, i32
  }
  func.func @transform_5(%arg0: i32, %arg1: i32) -> (i32, i32, i32) {
    %c0_i32 = arith.constant 0 : i32
    %c0_i32_0 = arith.constant 0 : i32
    return %arg0, %c0_i32, %arg1 : i32, i32, i32
  }
}

module attributes {stable_mosaic.version = 11 : i64} {
  func.func @_bilinear_kernel(%arg0: i32, %arg1: memref<1x8x4x4xbf16, #tpu.memory_space<vmem>>, %arg2: memref<16x4xbf16, #tpu.memory_space<vmem>>, %arg3: memref<4x16xbf16, #tpu.memory_space<vmem>>, %arg4: memref<1x8x16x16xf32, #tpu.memory_space<vmem>>) attributes {dimension_semantics = [#tpu.dimension_semantics<parallel>], iteration_bounds = array<i64: 2>, scalar_prefetch = 0 : i64, scratch_operands = 0 : i64, tpu.core_type = #tpu.core_type<tc>, window_params = [{transform_indices = @transform_0, window_bounds = array<i64: 1, 8, 4, 4>}, {pipeline_mode = #tpu.pipeline_mode<synchronous>, transform_indices = @transform_1, window_bounds = array<i64: 16, 4>}, {pipeline_mode = #tpu.pipeline_mode<synchronous>, transform_indices = @transform_2, window_bounds = array<i64: 4, 16>}, {transform_indices = @transform_3, window_bounds = array<i64: 1, 8, 16, 16>}]} {
    %c0 = arith.constant 0 : index
    %c0_0 = arith.constant 0 : index
    %c0_1 = arith.constant 0 : index
    %c0_2 = arith.constant 0 : index
    %0 = vector.load %arg1[%c0, %c0_0, %c0_1, %c0_2] : memref<1x8x4x4xbf16, #tpu.memory_space<vmem>>, vector<1x8x4x4xbf16>
    %1 = vector.shape_cast %0 : vector<1x8x4x4xbf16> to vector<8x4x4xbf16>
    %2 = vector.shape_cast %1 : vector<8x4x4xbf16> to vector<32x4xbf16>
    %c0_3 = arith.constant 0 : index
    %c0_4 = arith.constant 0 : index
    %3 = vector.load %arg3[%c0_3, %c0_4] : memref<4x16xbf16, #tpu.memory_space<vmem>>, vector<4x16xbf16>
    %cst = arith.constant dense<0.000000e+00> : vector<32x16xf32>
    %4 = tpu.matmul %2, %3, %cst {dimension_numbers = #tpu.dot_dimension_numbers<[1], [0], [0], [1], [0, 0, 1, 1], [], []>} : vector<32x4xbf16>, vector<4x16xbf16>, vector<32x16xf32> -> vector<32x16xf32>
    %5 = vector.shape_cast %4 : vector<32x16xf32> to vector<8x4x16xf32>
    %6 = arith.truncf %5 : vector<8x4x16xf32> to vector<8x4x16xbf16>
    %c0_5 = arith.constant 0 : index
    %c0_6 = arith.constant 0 : index
    %7 = vector.load %arg2[%c0_5, %c0_6] : memref<16x4xbf16, #tpu.memory_space<vmem>>, vector<16x4xbf16>
    %8 = vector.shape_cast %7 : vector<16x4xbf16> to vector<1x16x4xbf16>
    %9 = vector.broadcast %8 : vector<1x16x4xbf16> to vector<8x16x4xbf16>
    "tpu.trace_start"() <{level = 10 : i32, message = "coh,chw->cow"}> : () -> ()
    %cst_7 = arith.constant dense<0.000000e+00> : vector<8x16x16xf32>
    %10 = tpu.matmul %9, %6, %cst_7 {dimension_numbers = #tpu.dot_dimension_numbers<[2], [1], [1], [2], [0, 0, 0, 1, 1, 2], [0], [0]>} : vector<8x16x4xbf16>, vector<8x4x16xbf16>, vector<8x16x16xf32> -> vector<8x16x16xf32>
    "tpu.trace_stop"() : () -> ()
    %c0_8 = arith.constant 0 : index
    %c0_9 = arith.constant 0 : index
    %c0_10 = arith.constant 0 : index
    %c0_11 = arith.constant 0 : index
    %11 = vector.load %arg4[%c0_8, %c0_9, %c0_10, %c0_11] : memref<1x8x16x16xf32, #tpu.memory_space<vmem>>, vector<1x8x16x16xf32>
    %12 = vector.shape_cast %11 : vector<1x8x16x16xf32> to vector<8x16x16xf32>
    %13 = vector.shape_cast %10 : vector<8x16x16xf32> to vector<1x8x16x16xf32>
    tpu.vector_store %arg4[%c0_8, %c0_9, %c0_10, %c0_11], %13 {strides = array<i32>} : memref<1x8x16x16xf32, #tpu.memory_space<vmem>>, vector<1x8x16x16xf32>,
    return
  }
  func.func @transform_0(%arg0: i32) -> (i32, i32, i32, i32) {
    %c0_i32 = arith.constant 0 : i32
    %c0_i32_0 = arith.constant 0 : i32
    %c0_i32_1 = arith.constant 0 : i32
    %c0_i32_2 = arith.constant 0 : i32
    return %arg0, %c0_i32, %c0_i32_0, %c0_i32_1 : i32, i32, i32, i32
  }
  func.func @transform_1(%arg0: i32) -> (i32, i32) {
    %c0_i32 = arith.constant 0 : i32
    %c0_i32_0 = arith.constant 0 : i32
    %c0_i32_1 = arith.constant 0 : i32
    return %c0_i32, %c0_i32_0 : i32, i32
  }
  func.func @transform_2(%arg0: i32) -> (i32, i32) {
    %c0_i32 = arith.constant 0 : i32
    %c0_i32_0 = arith.constant 0 : i32
    %c0_i32_1 = arith.constant 0 : i32
    return %c0_i32, %c0_i32_0 : i32, i32
  }
  func.func @transform_3(%arg0: i32) -> (i32, i32, i32, i32) {
    %c0_i32 = arith.constant 0 : i32
    %c0_i32_0 = arith.constant 0 : i32
    %c0_i32_1 = arith.constant 0 : i32
    %c0_i32_2 = arith.constant 0 : i32
    return %arg0, %c0_i32, %c0_i32_0, %c0_i32_1 : i32, i32, i32, i32
  }
}

</mosaic_0001>

<bundles_post_ra>
// kernel: deeplabv3_forward.4
= control target key start
LH: loop header
LB: loop body
LE: loop exit
PB: predicated region body
PF: predicated region fallthrough
CT: control target
= control target key end

     0   :  { %s626_s12 = smov 0   ;;  %s628_s13 = smov 0   ;;  %s672_s0 = inlined_call_operand.vmem [shape: bf16[2,16,256], index: 0, kind: input, shape index: {}]   ;;  %s673_s1 = inlined_call_operand.vmem [shape: bf16[16,64], index: 1, kind: input, shape index: {}]   ;;  %s674_s2 = inlined_call_operand.vmem [shape: f32[16,1], index: 2, kind: input, shape index: {}]   ;;  %s675_s3 = inlined_call_operand.vmem [shape: bf16[2,16,128], index: 3, kind: output, shape index: {}]  }
   0x1   :  { %s630_s14 = smov 0  }
   0x2 LB: > { %s32_s15 = sadd.s32 1, %s594_s13  ;;  %p499_p0 = scmp.ge.s32.totalorder %s598_s14, 1  ;;  %s598_s14 = sphi %s630_s14, %s13_s14   ;;  %s594_s13 = sphi %s628_s13, %s677_s13   ;;  %s590_s12 = sphi %s626_s12, %s676_s12  }
   0x3   : > { %p34_p1 = scmp.ge.s32.totalorder %s32_s15, 2  ;;  %p182_p2 = scmp.lt.s32.totalorder %s598_s14, 3 }
   0x5   : > { %s679_s15 = smov (%p34_p1, %s32_s15), 0  ;;  %p183_p3 = pnand %p499_p0, %p182_p2 }
   0x6   : > { %p223_p4 = scmp.lt.s32.totalorder (!%p183_p3), %s590_s12, 1  ;;  %v600_v0 = vmov (!%p183_p3), 0.0   ;;  %s601_s20 = smov (!%p183_p3), 119   ;;  %vm603_vm0 = vmmov (!%p183_p3), 0   ;;  %v604_v4 = vmov (!%p183_p3), 0   ;;  %v295_v5 = vld [vmem:[%s674_s2] sm:$0xff] (!%p183_p3) }
   0x7   : > { %186 = sbr.rel (%p183_p3) target bundleno = 370 (0x172), region = 32  ;;  %527 = vmatprep.subr.bf16.mxu0 (!%p183_p3), %v600_v0  ;;  %s602_s21 = smov (!%p183_p3), 127   ;;  %535 = vmatprep.mubr.msk.bf16.mxu0 (!%p183_p3), %vm603_vm0, %v600_v0  ;;  %v296_v6 = vld [vmem:[%s674_s2 + $0x8] sm:$0xff] (!%p183_p3)  ;;  %vm276_vm1 = vcmask (!%p183_p3), 1039360   ;;  %vm283_vm2 = vcmask (!%p183_p3), 973824   ;;  %vm290_vm3 = vcmask (!%p183_p3), 965632  }
   0x8   : > { %569 = vset.pattern.permute.xlu0 (!%p183_p3), %v604_v4  ;;  %570 = vset.pattern.permute.xlu1 (!%p183_p3), %v604_v4  ;;  %s605_s22 = smov (!%p183_p3), 118   ;;  %v575_v16 = vld [vmem:[%s673_s1] sm:$0xff] (!%p183_p3)   ;;  %vm312_vm4 = vcmask (!%p183_p3), 523264  }
   0xe   : > { %s681_s12 = smov (!%p223_p4, %s590_s12), 1 }
   0xf   : > { %s513_s16 = sshll.u32 %s681_s12, 4  ;;  %s514_s29 = sshll.u32 %s681_s12, 3 }
  0x10   : > { %s227_s19 = scalar_lea.vmem %s672_s0, %s513_s16  ;;  %s251_s5 = scalar_lea.vmem %s675_s3, %s514_s29 }
  0x11   : > { %v571_v1 = vld [vmem:[%s227_s19] ss:$8 sps:$4 sm:$0xff]   ;;  %v573_v2 = vld [vmem:[%s227_s19 + $0x4] ss:$8 sps:$4 sm:$0xff]  }
  0x12   : > { %279 = vrot.lane.b32.xlu1 %v571_v1, %s601_s20  ;;  %272 = vrot.lane.b32.xlu0 %v571_v1, %s602_s21  ;;  %v574_v3 = vld [vmem:[%s227_s19] ss:$8 sps:$4 sm:$0xff]  }
  0x13   : > { %528 = vmatpush3.bf16.msra.mxu0 %v574_v3 }
  0x14   : > { %529 = vmatprep.subr.bf16.mxu0 %v600_v0 }
  0x16   : > { %281 = vrot.lane.b32.xlu1 %v573_v2, %s601_s20  ;;  %274 = vrot.lane.b32.xlu0 %v573_v2, %s602_s21 }
  0x1a   : > { %288 = vrot.lane.b32.xlu1 %v573_v2, %s605_s22  ;;  %286 = vrot.lane.b32.xlu0 %v571_v1, %s605_s22 }
  0x1e   : > { %299 = vperm.xlu0 %569, %v295_v5   ;;  %304 = vperm.xlu1 %570, %v296_v6  }
  0x84   : > { %v280_v7 = vpop.permute.xlu1 %279  ;;  %v273_v8 = vpop.permute.xlu0 %272 }
  0x88   : > { %v282_v9 = vpop.permute.xlu1 %281  ;;  %v275_v10 = vpop.permute.xlu0 %274 }
  0x89   : > { %v277_v11 = vsel %vm276_vm1, %v273_v8, %v275_v10  ;;  %v284_v14 = vsel %vm283_vm2, %v280_v7, %v282_v9 }
  0x8a   : > { %530 = vmatpush3.bf16.msra.mxu0 %v277_v11 }
  0x8b   : > { %531 = vmatprep.subr.bf16.mxu0 %v600_v0 }
  0x8c   : > { %v289_v12 = vpop.permute.xlu1 %288  ;;  %v287_v13 = vpop.permute.xlu0 %286 }
  0x8d   : > { %v291_v15 = vsel %vm290_vm3, %v287_v13, %v289_v12 }
  0x8e   : > { %532 = vmatpush3.bf16.msra.mxu0 %v284_v14 }
  0x8f   : > { %533 = vmatprep.subr.bf16.mxu0 %v600_v0 }
  0x92   : > { %534 = vmatpush3.bf16.msra.mxu0 %v291_v15 }
  0x95   : > { %536 = vmatmul.mubr.msk.bf16.vlgmr.msra.gmra.mrb[0].mxu0 %vm312_vm4, %v575_v16 }
  0x9d   : > { %v300_v17 = vpop.permute.xlu0 %299  ;;  %v305_v19 = vpop.permute.xlu1 %304 }
 0x168   : > { %v350_v18 = vpop.f32.mrb[0].mxu0 }
 0x169   : > { %v351_v20 = vadd.f32 %v350_v18, %v300_v17  ;;  %v537_v21 = vpop.f32.mrb[1].mxu0 }
 0x16a   : > { %v353_v22 = vpop.f32.mrb[2].mxu0 }
 0x16b   : > { %v354_v23 = vadd.f32 %v353_v22, %v305_v19  ;;  %v538_v24 = vpop.f32.mrb[3].mxu0  ;;  %v357_v25 = vmax.f32 %v351_v20, 0.0 }
 0x16d   : > { %v358_v26 = vmax.f32 %v354_v23, 0.0 }
 0x16f   : > { %v520_v27 = vpack.c.bf16 %v358_v26, %v357_v25 }
 0x171   : > { %521 = vst [vmem:[%s251_s5] sm:$0xff] %v520_v27  }
 0x172 PF: > { %s13_s14 = sadd.s32 1, %s598_s14   ;;  %s676_s12 = smov %s594_s13 }
 0x173   : > { %p10_p5 = scmp.ge.s32.totalorder %s13_s14, 4   ;;  %s677_s13 = smov %s679_s15 }
 0x175   :  { %12 = sbr.rel (!%p10_p5) target bundleno = 2 (0x2), region = 68 }

// kernel: deeplabv3_forward.5
= control target key start
LH: loop header
LB: loop body
LE: loop exit
PB: predicated region body
PF: predicated region fallthrough
CT: control target
= control target key end

     0   :  { %s843_s12 = smov 0   ;;  %s845_s13 = smov 0   ;;  %s930_s0 = inlined_call_operand.vmem [shape: bf16[2,64,256], index: 0, kind: input, shape index: {}]   ;;  %s931_s1 = inlined_call_operand.vmem [shape: bf16[32,256], index: 1, kind: input, shape index: {}]   ;;  %s932_s2 = inlined_call_operand.vmem [shape: f32[32,1], index: 2, kind: input, shape index: {}]   ;;  %s933_s3 = inlined_call_operand.vmem [shape: bf16[2,32,128], index: 3, kind: output, shape index: {}]  }
   0x1   :  { %s847_s14 = smov 0  }
   0x2 LB: > { %s32_s15 = sadd.s32 1, %s813_s13  ;;  %p655_p0 = scmp.ge.s32.totalorder %s817_s14, 1  ;;  %s817_s14 = sphi %s847_s14, %s13_s14   ;;  %s813_s13 = sphi %s845_s13, %s935_s13   ;;  %s809_s12 = sphi %s843_s12, %s934_s12  }
   0x3   : > { %p34_p1 = scmp.ge.s32.totalorder %s32_s15, 2  ;;  %p183_p2 = scmp.lt.s32.totalorder %s817_s14, 3 }
   0x5   : > { %s937_s15 = smov (%p34_p1, %s32_s15), 0  ;;  %p184_p3 = pnand %p655_p0, %p183_p2 }
   0x6   : > { %p225_p4 = scmp.lt.s32.totalorder (!%p184_p3), %s809_s12, 1  ;;  %s819_s20 = smov (!%p184_p3), 123   ;;  %v791_v8 = vld [vmem:[%s931_s1 + $0x4] ss:$8 sps:$4 sm:$0xff] (!%p184_p3)   ;;  %v794_v9 = vld [vmem:[%s931_s1 + $0x14] ss:$8 sps:$4 sm:$0xff] (!%p184_p3)  }
   0x7   : > { %187 = sbr.rel (%p184_p3) target bundleno = 405 (0x195), region = 32  ;;  %s820_s21 = smov (!%p184_p3), 122   ;;  %484 = vmatprep.mubr.bf16.mxu0 (!%p184_p3), %v791_v8  ;;  %492 = vmatprep.mubr.bf16.mxu1 (!%p184_p3), %v794_v9  ;;  %v822_v10 = vmov (!%p184_p3), 0   ;;  %v409_v11 = vld [vmem:[%s932_s2 + $0x8] sm:$0xff] (!%p184_p3)  ;;  %v408_v12 = vld [vmem:[%s932_s2] sm:$0xff] (!%p184_p3)  ;;  %v410_v13 = vld [vmem:[%s932_s2 + $0x10] sm:$0xff] (!%p184_p3) }
   0x8   : > { %s821_s22 = smov (!%p184_p3), 127   ;;  %772 = vset.pattern.permute.xlu1 (!%p184_p3), %v822_v10  ;;  %771 = vset.pattern.permute.xlu0 (!%p184_p3), %v822_v10  ;;  %v411_v14 = vld [vmem:[%s932_s2 + $0x18] sm:$0xff] (!%p184_p3)  ;;  %vm370_vm0 = vcmask (!%p184_p3), 1006592   ;;  %vm395_vm1 = vcmask (!%p184_p3), 998400   ;;  %vm345_vm2 = vcmask (!%p184_p3), 1039360  }
   0x9   : > { %v789_v55 = vld [vmem:[%s931_s1] ss:$8 sps:$4 sm:$0xff] (!%p184_p3)   ;;  %v792_v56 = vld [vmem:[%s931_s1 + $0x10] ss:$8 sps:$4 sm:$0xff] (!%p184_p3)  }
   0xe   : > { %s939_s12 = smov (!%p225_p4, %s809_s12), 1 }
   0xf   : > { %s682_s16 = sshll.u32 %s939_s12, 6 }
  0x10   : > { %s867_s19 = scalar_lea.vmem %s930_s0, %s682_s16  ;;  %s683_s16 = sshll.u32 %s939_s12, 4 }
  0x11   : > { %v773_v0 = vld [vmem:[%s867_s19 + $0x10] ss:$8 sps:$4 sm:$0xff]   ;;  %v775_v1 = vld [vmem:[%s867_s19] ss:$8 sps:$4 sm:$0xff]   ;;  %v777_v2 = vld [vmem:[%s867_s19 + $0x14] ss:$8 sps:$4 sm:$0xff]  }
  0x12   : > { %358 = vrot.lane.b32.xlu1 %v773_v0, %s819_s20  ;;  %354 = vrot.lane.b32.xlu0 %v775_v1, %s819_s20  ;;  %v778_v3 = vld [vmem:[%s867_s19 + $0x4] ss:$8 sps:$4 sm:$0xff]   ;;  %v781_v5 = vld [vmem:[%s867_s19 + $0x20] ss:$8 sps:$4 sm:$0xff]  }
  0x13   : > { %v779_v4 = vld [vmem:[%s867_s19 + $0x24] ss:$8 sps:$4 sm:$0xff]   ;;  %v782_v6 = vld [vmem:[%s867_s19 + $0x34] ss:$8 sps:$4 sm:$0xff]   ;;  %v784_v7 = vld [vmem:[%s867_s19 + $0x30] ss:$8 sps:$4 sm:$0xff]  }
  0x14   : > { %v785_v18 = vld [vmem:[%s867_s19] ss:$8 sps:$4 sm:$0xff]   ;;  %v786_v23 = vld [vmem:[%s867_s19 + $0x10] ss:$8 sps:$4 sm:$0xff]  }
  0x15   : > { %v787_v27 = vld [vmem:[%s867_s19 + $0x20] ss:$8 sps:$4 sm:$0xff]   ;;  %v788_v31 = vld [vmem:[%s867_s19 + $0x30] ss:$8 sps:$4 sm:$0xff]   ;;  %s254_s19 = scalar_lea.vmem %s933_s3, %s683_s16 }
  0x16   : > { %360 = vrot.lane.b32.xlu1 %v777_v2, %s819_s20  ;;  %356 = vrot.lane.b32.xlu0 %v778_v3, %s819_s20 }
  0x1a   : > { %364 = vrot.lane.b32.xlu1 %v779_v4, %s819_s20  ;;  %362 = vrot.lane.b32.xlu0 %v781_v5, %s819_s20 }
  0x1e   : > { %368 = vrot.lane.b32.xlu1 %v782_v6, %s819_s20  ;;  %366 = vrot.lane.b32.xlu0 %v784_v7, %s819_s20 }
  0x22   : > { %381 = vrot.lane.b32.xlu1 %v778_v3, %s820_s21  ;;  %379 = vrot.lane.b32.xlu0 %v775_v1, %s820_s21 }
  0x26   : > { %331 = vrot.lane.b32.xlu1 %v778_v3, %s821_s22  ;;  %329 = vrot.lane.b32.xlu0 %v775_v1, %s821_s22 }
  0x2a   : > { %385 = vrot.lane.b32.xlu1 %v777_v2, %s820_s21  ;;  %383 = vrot.lane.b32.xlu0 %v773_v0, %s820_s21 }
  0x2e   : > { %335 = vrot.lane.b32.xlu1 %v777_v2, %s821_s22  ;;  %333 = vrot.lane.b32.xlu0 %v773_v0, %s821_s22 }
  0x32   : > { %389 = vrot.lane.b32.xlu1 %v779_v4, %s820_s21  ;;  %387 = vrot.lane.b32.xlu0 %v781_v5, %s820_s21 }
  0x36   : > { %339 = vrot.lane.b32.xlu1 %v779_v4, %s821_s22  ;;  %337 = vrot.lane.b32.xlu0 %v781_v5, %s821_s22 }
  0x3a   : > { %393 = vrot.lane.b32.xlu1 %v782_v6, %s820_s21  ;;  %391 = vrot.lane.b32.xlu0 %v784_v7, %s820_s21 }
  0x3e   : > { %343 = vrot.lane.b32.xlu1 %v782_v6, %s821_s22  ;;  %341 = vrot.lane.b32.xlu0 %v784_v7, %s821_s22 }
  0x42   : > { %419 = vperm.xlu1 %772, %v409_v11   ;;  %414 = vperm.xlu0 %771, %v408_v12  }
  0x46   : > { %424 = vperm.xlu1 %772, %v410_v13   ;;  %429 = vperm.xlu0 %771, %v411_v14  }
  0x84   : > { %v359_v15 = vpop.permute.xlu1 %358  ;;  %v355_v16 = vpop.permute.xlu0 %354 }
  0x88   : > { %v361_v17 = vpop.permute.xlu1 %360  ;;  %v357_v19 = vpop.permute.xlu0 %356 }
  0x89   : > { %v371_v20 = vsel %vm370_vm0, %v355_v16, %v357_v19  ;;  %v372_v22 = vsel %vm370_vm0, %v359_v15, %v361_v17 }
  0x8a   : > { %699 = vmatprep.subr.bf16.mxu0 %v371_v20  ;;  %727 = vmatprep.subr.bf16.mxu1 %v371_v20 }
  0x8b   : > { %700 = vmatpush3.bf16.msra.mxu0 %v785_v18  ;;  %735 = vmatpush3.bf16.msra.mxu1 %v785_v18 }
  0x8c   : > { %v365_v21 = vpop.permute.xlu1 %364  ;;  %v363_v24 = vpop.permute.xlu0 %362  ;;  %701 = vmatprep.subr.bf16.mxu0 %v372_v22  ;;  %728 = vmatprep.subr.bf16.mxu1 %v372_v22 }
  0x8d   : > { %v373_v26 = vsel %vm370_vm0, %v363_v24, %v365_v21 }
  0x8f   : > { %702 = vmatpush3.bf16.msra.mxu0 %v786_v23  ;;  %736 = vmatpush3.bf16.msra.mxu1 %v786_v23 }
  0x90   : > { %v369_v25 = vpop.permute.xlu1 %368  ;;  %v367_v28 = vpop.permute.xlu0 %366  ;;  %703 = vmatprep.subr.bf16.mxu0 %v373_v26  ;;  %729 = vmatprep.subr.bf16.mxu1 %v373_v26 }
  0x91   : > { %v374_v30 = vsel %vm370_vm0, %v367_v28, %v369_v25 }
  0x93   : > { %704 = vmatpush3.bf16.msra.mxu0 %v787_v27  ;;  %737 = vmatpush3.bf16.msra.mxu1 %v787_v27 }
  0x94   : > { %v382_v29 = vpop.permute.xlu1 %381  ;;  %v380_v32 = vpop.permute.xlu0 %379  ;;  %705 = vmatprep.subr.bf16.mxu0 %v374_v30  ;;  %730 = vmatprep.subr.bf16.mxu1 %v374_v30 }
  0x95   : > { %v396_v34 = vsel %vm395_vm1, %v380_v32, %v382_v29 }
  0x97   : > { %706 = vmatpush3.bf16.msra.mxu0 %v788_v31  ;;  %738 = vmatpush3.bf16.msra.mxu1 %v788_v31 }
  0x98   : > { %v332_v33 = vpop.permute.xlu1 %331  ;;  %v330_v35 = vpop.permute.xlu0 %329  ;;  %707 = vmatprep.subr.bf16.mxu0 %v396_v34  ;;  %731 = vmatprep.subr.bf16.mxu1 %v396_v34 }
  0x99   : > { %v346_v36 = vsel %vm345_vm2, %v330_v35, %v332_v33 }
  0x9b   : > { %708 = vmatpush3.bf16.msra.mxu0 %v346_v36  ;;  %739 = vmatpush3.bf16.msra.mxu1 %v346_v36 }
  0x9c   : > { %v386_v37 = vpop.permute.xlu1 %385  ;;  %v384_v38 = vpop.permute.xlu0 %383 }
  0x9d   : > { %v397_v39 = vsel %vm395_vm1, %v384_v38, %v386_v37 }
  0x9e   : > { %709 = vmatprep.subr.bf16.mxu0 %v397_v39  ;;  %732 = vmatprep.subr.bf16.mxu1 %v397_v39 }
  0xa0   : > { %v336_v40 = vpop.permute.xlu1 %335  ;;  %v334_v41 = vpop.permute.xlu0 %333 }
  0xa1   : > { %v347_v42 = vsel %vm345_vm2, %v334_v41, %v336_v40 }
  0xa2   : > { %710 = vmatpush3.bf16.msra.mxu0 %v347_v42  ;;  %740 = vmatpush3.bf16.msra.mxu1 %v347_v42 }
  0xa4   : > { %v390_v43 = vpop.permute.xlu1 %389  ;;  %v388_v44 = vpop.permute.xlu0 %387 }
  0xa5   : > { %v398_v45 = vsel %vm395_vm1, %v388_v44, %v390_v43 }
  0xa6   : > { %711 = vmatprep.subr.bf16.mxu0 %v398_v45  ;;  %733 = vmatprep.subr.bf16.mxu1 %v398_v45 }
  0xa8   : > { %v340_v46 = vpop.permute.xlu1 %339  ;;  %v338_v47 = vpop.permute.xlu0 %337 }
  0xa9   : > { %v348_v48 = vsel %vm345_vm2, %v338_v47, %v340_v46 }
  0xaa   : > { %712 = vmatpush3.bf16.msra.mxu0 %v348_v48  ;;  %741 = vmatpush3.bf16.msra.mxu1 %v348_v48 }
  0xac   : > { %v394_v49 = vpop.permute.xlu1 %393  ;;  %v392_v50 = vpop.permute.xlu0 %391 }
  0xad   : > { %v399_v51 = vsel %vm395_vm1, %v392_v50, %v394_v49 }
  0xae   : > { %713 = vmatprep.subr.bf16.mxu0 %v399_v51  ;;  %734 = vmatprep.subr.bf16.mxu1 %v399_v51 }
  0xb0   : > { %v344_v52 = vpop.permute.xlu1 %343  ;;  %v342_v53 = vpop.permute.xlu0 %341 }
  0xb1   : > { %v349_v54 = vsel %vm345_vm2, %v342_v53, %v344_v52 }
  0xb2   : > { %714 = vmatpush3.bf16.msra.mxu0 %v349_v54  ;;  %742 = vmatpush3.bf16.msra.mxu1 %v349_v54 }
  0xb5   : > { %485 = vmatmul.mubr.bf16.vlgmr.msra.gmra.mrb[0].mxu0 %v789_v55  ;;  %493 = vmatmul.mubr.bf16.vlgmr.msra.gmra.mrb[0].mxu1 %v792_v56 }
  0xc1   : > { %v420_v57 = vpop.permute.xlu1 %419  ;;  %v415_v58 = vpop.permute.xlu0 %414 }
  0xc5   : > { %v425_v59 = vpop.permute.xlu1 %424  ;;  %v430_v10 = vpop.permute.xlu0 %429 }
 0x188   : > { %v715_v60 = vpop.f32.mrb[0].mxu0  ;;  %v721_v61 = vpop.f32.mrb[0].mxu1 }
 0x189   : > { %v716_v62 = vpop.f32.mrb[1].mxu0  ;;  %v722_v63 = vpop.f32.mrb[1].mxu1 }
 0x18a   : > { %v717_v0 = vadd.f32 %v716_v62, %v715_v60  ;;  %v723_v1 = vadd.f32 %v722_v63, %v721_v61  ;;  %v718_v2 = vpop.f32.mrb[2].mxu0  ;;  %v724_v3 = vpop.f32.mrb[2].mxu1 }
 0x18b   : > { %v719_v4 = vpop.f32.mrb[3].mxu0  ;;  %v725_v5 = vpop.f32.mrb[3].mxu1 }
 0x18c   : > { %v487_v6 = vadd.f32 %v717_v0, %v415_v58  ;;  %v495_v7 = vadd.f32 %v723_v1, %v425_v59  ;;  %v720_v8 = vadd.f32 %v719_v4, %v718_v2  ;;  %v726_v9 = vadd.f32 %v725_v5, %v724_v3 }
 0x18e   : > { %v490_v11 = vadd.f32 %v720_v8, %v420_v57  ;;  %v498_v12 = vadd.f32 %v726_v9, %v430_v10  ;;  %v501_v13 = vmax.f32 %v487_v6, 0.0  ;;  %v503_v14 = vmax.f32 %v495_v7, 0.0 }
 0x190   : > { %v502_v15 = vmax.f32 %v490_v11, 0.0  ;;  %v504_v16 = vmax.f32 %v498_v12, 0.0 }
 0x192   : > { %v691_v17 = vpack.c.bf16 %v502_v15, %v501_v13  ;;  %v696_v18 = vpack.c.bf16 %v504_v16, %v503_v14 }
 0x194   : > { %692 = vst [vmem:[%s254_s19] sm:$0xff] %v691_v17   ;;  %698 = vst [vmem:[%s254_s19 + $0x8] sm:$0xff] %v696_v18  }
 0x195 PF: > { %s13_s14 = sadd.s32 1, %s817_s14   ;;  %s934_s12 = smov %s813_s13 }
 0x196   : > { %p10_p5 = scmp.ge.s32.totalorder %s13_s14, 4   ;;  %s935_s13 = smov %s937_s15 }
 0x198   :  { %12 = sbr.rel (!%p10_p5) target bundleno = 2 (0x2), region = 68 }

// kernel: deeplabv3_forward.6
= control target key start
LH: loop header
LB: loop body
LE: loop exit
PB: predicated region body
PF: predicated region fallthrough
CT: control target
= control target key end

     0   :  { %s875_s18 = smov 0   ;;  %s877_s19 = smov 0   ;;  %s959_s0 = inlined_call_operand.vmem [shape: bf16[2,32,256], index: 0, kind: input, shape index: {}]   ;;  %s960_s1 = inlined_call_operand.vmem [shape: bf16[32,288], index: 1, kind: input, shape index: {}]   ;;  %s961_s2 = inlined_call_operand.vmem [shape: f32[32,1], index: 2, kind: input, shape index: {}]   ;;  %s962_s3 = inlined_call_operand.vmem [shape: bf16[8,32], index: 3, kind: input, shape index: {}]   ;;  %s963_s4 = inlined_call_operand.vmem [shape: f32[8,1], index: 4, kind: input, shape index: {}]   ;;  %s964_s5 = inlined_call_operand.vmem [shape: bf16[2,8,128], index: 5, kind: output, shape index: {}]  }
   0x1   :  { %s879_s20 = smov 0  }
   0x2 LB: > { %s27_s21 = sadd.s32 1, %s828_s19  ;;  %p684_p0 = scmp.ge.s32.totalorder %s832_s20, 1  ;;  %s832_s20 = sphi %s879_s20, %s15_s20   ;;  %s828_s19 = sphi %s877_s19, %s966_s19   ;;  %s824_s18 = sphi %s875_s18, %s965_s18  }
   0x3   : > { %p29_p1 = scmp.ge.s32.totalorder %s27_s21, 2  ;;  %p201_p2 = scmp.lt.s32.totalorder %s832_s20, 3 }
   0x5   : > { %s968_s21 = smov (%p29_p1, %s27_s21), 0  ;;  %p202_p3 = pnand %p684_p0, %p201_p2 }
   0x6   : > { %p231_p4 = scmp.lt.s32.totalorder (!%p202_p3), %s824_s18, 1  ;;  %s834_s26 = smov (!%p202_p3), 121   ;;  %v804_v4 = vld [vmem:[%s960_s1 + $0x4] ss:$12 sps:$4 sm:$0xff] (!%p202_p3)   ;;  %v808_v5 = vld [vmem:[%s960_s1 + $0x8] ss:$12 sps:$4 sm:$0xff] (!%p202_p3)  }
   0x7   : > { %205 = sbr.rel (%p202_p3) target bundleno = 643 (0x283), region = 40  ;;  %s835_s27 = smov (!%p202_p3), 120   ;;  %485 = vmatprep.mubr.bf16.mxu0 (!%p202_p3), %v804_v4  ;;  %vm446_vm0 = vcmask (!%p202_p3), 261120   ;;  %v841_v6 = vmov (!%p202_p3), 0   ;;  %v393_v7 = vld [vmem:[%s961_s2 + $0x8] sm:$0xff] (!%p202_p3)  ;;  %v392_v8 = vld [vmem:[%s961_s2] sm:$0xff] (!%p202_p3) }
   0x8   : > { %s836_s28 = smov (!%p202_p3), 127   ;;  %s837_s29 = smov (!%p202_p3), 116   ;;  %745 = vmatprep.mubr.msk.bf16.mxu1 (!%p202_p3), %vm446_vm0, %v808_v5  ;;  %793 = vset.pattern.permute.xlu1 (!%p202_p3), %v841_v6  ;;  %v394_v9 = vld [vmem:[%s961_s2 + $0x10] sm:$0xff] (!%p202_p3)  ;;  %v395_v10 = vld [vmem:[%s961_s2 + $0x18] sm:$0xff] (!%p202_p3)  ;;  %v558_v11 = vld [vmem:[%s963_s4] sm:$0xff] (!%p202_p3)  ;;  %vm327_vm1 = vcmask (!%p202_p3), 990208  }
   0x9   : > { %s838_s30 = smov (!%p202_p3), 126   ;;  %s839_s6 = smov (!%p202_p3), 115   ;;  %792 = vset.pattern.permute.xlu0 (!%p202_p3), %v841_v6  ;;  %vm340_vm2 = vcmask (!%p202_p3), 982016   ;;  %vm288_vm3 = vcmask (!%p202_p3), 1039360   ;;  %vm353_vm4 = vcmask (!%p202_p3), 949248   ;;  %vm301_vm5 = vcmask (!%p202_p3), 1031168  }
   0xa   : > { %s840_s9 = smov (!%p202_p3), 122   ;;  %s842_s12 = smov (!%p202_p3), 114   ;;  %vm366_vm6 = vcmask (!%p202_p3), 941056   ;;  %vm314_vm7 = vcmask (!%p202_p3), 998400   ;;  %v802_v56 = vld [vmem:[%s960_s1] ss:$12 sps:$4 sm:$0xff] (!%p202_p3)  }
   0xb   : > { %vm379_vm8 = vcmask (!%p202_p3), 932864   ;;  %v805_v57 = vld [vmem:[%s960_s1 + $0x1c] ss:$12 sps:$4 sm:$0xff] (!%p202_p3)   ;;  %vm844_vm9 = vmmov (!%p202_p3), 0  }
   0xe   : > { %s970_s18 = smov (!%p231_p4, %s824_s18), 1 }
   0xf   : > { %s705_s22 = sshll.u32 %s970_s18, 5 }
  0x10   : > { %s899_s25 = scalar_lea.vmem %s959_s0, %s705_s22 }
  0x11   : > { %v794_v0 = vld [vmem:[%s899_s25 + $0x10] ss:$8 sps:$4 sm:$0xff]   ;;  %v796_v1 = vld [vmem:[%s899_s25] ss:$8 sps:$4 sm:$0xff]   ;;  %v798_v2 = vld [vmem:[%s899_s25 + $0x14] ss:$8 sps:$4 sm:$0xff]  }
  0x12   : > { %323 = vrot.lane.b32.xlu1 %v794_v0, %s834_s26  ;;  %319 = vrot.lane.b32.xlu0 %v796_v1, %s834_s26  ;;  %v799_v3 = vld [vmem:[%s899_s25 + $0x4] ss:$8 sps:$4 sm:$0xff]   ;;  %v800_v15 = vld [vmem:[%s899_s25] ss:$8 sps:$4 sm:$0xff]  }
  0x13   : > { %v801_v20 = vld [vmem:[%s899_s25 + $0x10] ss:$8 sps:$4 sm:$0xff]  }
  0x16   : > { %325 = vrot.lane.b32.xlu1 %v798_v2, %s834_s26  ;;  %321 = vrot.lane.b32.xlu0 %v799_v3, %s834_s26 }
  0x1a   : > { %334 = vrot.lane.b32.xlu1 %v799_v3, %s835_s27  ;;  %332 = vrot.lane.b32.xlu0 %v796_v1, %s835_s27 }
  0x1e   : > { %282 = vrot.lane.b32.xlu1 %v799_v3, %s836_s28  ;;  %280 = vrot.lane.b32.xlu0 %v796_v1, %s836_s28 }
  0x22   : > { %338 = vrot.lane.b32.xlu1 %v798_v2, %s835_s27  ;;  %336 = vrot.lane.b32.xlu0 %v794_v0, %s835_s27 }
  0x26   : > { %286 = vrot.lane.b32.xlu1 %v798_v2, %s836_s28  ;;  %284 = vrot.lane.b32.xlu0 %v794_v0, %s836_s28 }
  0x2a   : > { %347 = vrot.lane.b32.xlu1 %v799_v3, %s837_s29  ;;  %345 = vrot.lane.b32.xlu0 %v796_v1, %s837_s29 }
  0x2e   : > { %295 = vrot.lane.b32.xlu1 %v799_v3, %s838_s30  ;;  %293 = vrot.lane.b32.xlu0 %v796_v1, %s838_s30 }
  0x32   : > { %351 = vrot.lane.b32.xlu1 %v798_v2, %s837_s29  ;;  %349 = vrot.lane.b32.xlu0 %v794_v0, %s837_s29 }
  0x36   : > { %299 = vrot.lane.b32.xlu1 %v798_v2, %s838_s30  ;;  %297 = vrot.lane.b32.xlu0 %v794_v0, %s838_s30 }
  0x3a   : > { %360 = vrot.lane.b32.xlu1 %v799_v3, %s839_s6  ;;  %358 = vrot.lane.b32.xlu0 %v796_v1, %s839_s6 }
  0x3e   : > { %308 = vrot.lane.b32.xlu1 %v799_v3, %s840_s9  ;;  %306 = vrot.lane.b32.xlu0 %v796_v1, %s840_s9 }
  0x42   : > { %364 = vrot.lane.b32.xlu1 %v798_v2, %s839_s6  ;;  %362 = vrot.lane.b32.xlu0 %v794_v0, %s839_s6 }
  0x46   : > { %312 = vrot.lane.b32.xlu1 %v798_v2, %s840_s9  ;;  %310 = vrot.lane.b32.xlu0 %v794_v0, %s840_s9 }
  0x4a   : > { %373 = vrot.lane.b32.xlu1 %v799_v3, %s842_s12  ;;  %371 = vrot.lane.b32.xlu0 %v796_v1, %s842_s12  ;;  %v809_v1 = vld [vmem:[%s960_s1 + $0x20] ss:$12 sps:$4 sm:$0xff]  }
  0x4e   : > { %377 = vrot.lane.b32.xlu1 %v798_v2, %s842_s12  ;;  %375 = vrot.lane.b32.xlu0 %v794_v0, %s842_s12  ;;  %v807_v0 = vld [vmem:[%s960_s1 + $0x18] ss:$12 sps:$4 sm:$0xff]   ;;  %v843_v2 = vmov 0.0   ;;  %s687_s12 = sshll.u32 %s970_s18, 2 }
  0x4f   : > { %s242_s15 = scalar_lea.vmem %s964_s5, %s687_s12 }
  0x52   : > { %403 = vperm.xlu1 %793, %v393_v7   ;;  %398 = vperm.xlu0 %792, %v392_v8  }
  0x56   : > { %408 = vperm.xlu1 %793, %v394_v9   ;;  %413 = vperm.xlu0 %792, %v395_v10  }
  0x5a   : > { %561 = vperm.xlu1 %793, %v558_v11  }
  0x84   : > { %v324_v12 = vpop.permute.xlu1 %323  ;;  %v320_v13 = vpop.permute.xlu0 %319 }
  0x88   : > { %v326_v14 = vpop.permute.xlu1 %325  ;;  %v322_v16 = vpop.permute.xlu0 %321 }
  0x89   : > { %v328_v17 = vsel %vm327_vm1, %v320_v13, %v322_v16  ;;  %v329_v19 = vsel %vm327_vm1, %v324_v12, %v326_v14 }
  0x8a   : > { %706 = vmatprep.subr.bf16.mxu0 %v328_v17 }
  0x8b   : > { %707 = vmatpush3.bf16.msra.mxu0 %v800_v15 }
  0x8c   : > { %v335_v18 = vpop.permute.xlu1 %334  ;;  %v333_v21 = vpop.permute.xlu0 %332  ;;  %708 = vmatprep.subr.bf16.mxu0 %v329_v19 }
  0x8d   : > { %v341_v23 = vsel %vm340_vm2, %v333_v21, %v335_v18 }
  0x8f   : > { %709 = vmatpush3.bf16.msra.mxu0 %v801_v20 }
  0x90   : > { %v283_v22 = vpop.permute.xlu1 %282  ;;  %v281_v24 = vpop.permute.xlu0 %280  ;;  %710 = vmatprep.subr.bf16.mxu0 %v341_v23 }
  0x91   : > { %v289_v25 = vsel %vm288_vm3, %v281_v24, %v283_v22 }
  0x93   : > { %711 = vmatpush3.bf16.msra.mxu0 %v289_v25 }
  0x94   : > { %v339_v26 = vpop.permute.xlu1 %338  ;;  %v337_v27 = vpop.permute.xlu0 %336 }
  0x95   : > { %v342_v28 = vsel %vm340_vm2, %v337_v27, %v339_v26 }
  0x96   : > { %712 = vmatprep.subr.bf16.mxu0 %v342_v28 }
  0x98   : > { %v287_v29 = vpop.permute.xlu1 %286  ;;  %v285_v30 = vpop.permute.xlu0 %284 }
  0x99   : > { %v290_v31 = vsel %vm288_vm3, %v285_v30, %v287_v29 }
  0x9a   : > { %713 = vmatpush3.bf16.msra.mxu0 %v290_v31 }
  0x9c   : > { %v348_v32 = vpop.permute.xlu1 %347  ;;  %v346_v33 = vpop.permute.xlu0 %345 }
  0x9d   : > { %v354_v34 = vsel %vm353_vm4, %v346_v33, %v348_v32 }
  0x9e   : > { %714 = vmatprep.subr.bf16.mxu0 %v354_v34 }
  0xa0   : > { %v296_v35 = vpop.permute.xlu1 %295  ;;  %v294_v36 = vpop.permute.xlu0 %293 }
  0xa1   : > { %v302_v37 = vsel %vm301_vm5, %v294_v36, %v296_v35 }
  0xa2   : > { %715 = vmatpush3.bf16.msra.mxu0 %v302_v37  ;;  %v557_v37 = vld [vmem:[%s962_s3] sm:$0xf] }
  0xa4   : > { %v352_v38 = vpop.permute.xlu1 %351  ;;  %v350_v39 = vpop.permute.xlu0 %349 }
  0xa5   : > { %v355_v40 = vsel %vm353_vm4, %v350_v39, %v352_v38 }
  0xa6   : > { %716 = vmatprep.subr.bf16.mxu0 %v355_v40 }
  0xa8   : > { %v300_v41 = vpop.permute.xlu1 %299  ;;  %v298_v42 = vpop.permute.xlu0 %297 }
  0xa9   : > { %v303_v43 = vsel %vm301_vm5, %v298_v42, %v300_v41 }
  0xaa   : > { %717 = vmatpush3.bf16.msra.mxu0 %v303_v43 }
  0xac   : > { %v361_v44 = vpop.permute.xlu1 %360  ;;  %v359_v45 = vpop.permute.xlu0 %358 }
  0xad   : > { %v367_v46 = vsel %vm366_vm6, %v359_v45, %v361_v44 }
  0xae   : > { %718 = vmatprep.subr.bf16.mxu0 %v367_v46 }
  0xb0   : > { %v309_v47 = vpop.permute.xlu1 %308  ;;  %v307_v48 = vpop.permute.xlu0 %306 }
  0xb1   : > { %v315_v49 = vsel %vm314_vm7, %v307_v48, %v309_v47 }
  0xb2   : > { %719 = vmatpush3.bf16.msra.mxu0 %v315_v49 }
  0xb4   : > { %v365_v50 = vpop.permute.xlu1 %364  ;;  %v363_v51 = vpop.permute.xlu0 %362 }
  0xb5   : > { %v368_v52 = vsel %vm366_vm6, %v363_v51, %v365_v50 }
  0xb6   : > { %720 = vmatprep.subr.bf16.mxu0 %v368_v52 }
  0xb8   : > { %v313_v53 = vpop.permute.xlu1 %312  ;;  %v311_v54 = vpop.permute.xlu0 %310 }
  0xb9   : > { %v316_v55 = vsel %vm314_vm7, %v311_v54, %v313_v53 }
  0xba   : > { %721 = vmatpush3.bf16.msra.mxu0 %v316_v55 }
  0xbc   : > { %v374_v58 = vpop.permute.xlu1 %373  ;;  %v372_v59 = vpop.permute.xlu0 %371 }
  0xbd   : > { %486 = vmatmul.mubr.bf16.vlgmr.msra.gmra.mrb[0].mxu0 %v802_v56  ;;  %v380_v60 = vsel %vm379_vm8, %v372_v59, %v374_v58 }
  0xbe   : > { %741 = vmatprep.subr.bf16.mxu1 %v380_v60  ;;  %493 = vmatprep.mubr.bf16.mxu0 %v805_v57 }
  0xbf   : > { %742 = vmatpush3.bf16.msra.mxu1 %v380_v60 }
  0xc0   : > { %v378_v61 = vpop.permute.xlu1 %377  ;;  %v376_v62 = vpop.permute.xlu0 %375 }
  0xc1   : > { %v381_v63 = vsel %vm379_vm8, %v376_v62, %v378_v61 }
  0xc2   : > { %743 = vmatprep.subr.bf16.mxu1 %v381_v63 }
  0xc3   : > { %744 = vmatpush3.bf16.msra.mxu1 %v381_v63 }
  0xc4   : > { %749 = vmatprep.subr.bf16.mxu1 %v843_v2 }
  0xc5   : > { %494 = vmatmul.mubr.bf16.gmra.mrb[4].mxu0 %v807_v0 }
  0xc6   : > { %746 = vmatmul.mubr.msk.bf16.vlgmr.msra.gmra.mrb[0].mxu1 %vm446_vm0, %v809_v1 }
  0xc7   : > { %753 = vmatprep.mubr.msk.bf16.mxu1 %vm844_vm9, %v843_v2 }
  0xd1   : > { %v404_v6 = vpop.permute.xlu1 %403  ;;  %v399_v10 = vpop.permute.xlu0 %398 }
  0xd5   : > { %v409_v11 = vpop.permute.xlu1 %408  ;;  %v414_v26 = vpop.permute.xlu0 %413 }
  0xd9   : > { %v562_v38 = vpop.permute.xlu1 %561 }
 0x190   : > { %v722_v3 = vpop.f32.mrb[0].mxu0 }
 0x191   : > { %v723_v4 = vpop.f32.mrb[1].mxu0 }
 0x192   : > { %v724_v5 = vadd.f32 %v723_v4, %v722_v3  ;;  %v725_v7 = vpop.f32.mrb[2].mxu0 }
 0x193   : > { %v726_v8 = vpop.f32.mrb[3].mxu0 }
 0x194   : > { %v727_v9 = vadd.f32 %v726_v8, %v725_v7  ;;  %v488_v13 = vadd.f32 %v724_v5, %v399_v10 }
 0x196   : > { %v491_v22 = vadd.f32 %v727_v9, %v404_v6 }
 0x198   : > { %v728_v12 = vpop.f32.mrb[4].mxu0 }
 0x199   : > { %v729_v14 = vpop.f32.mrb[5].mxu0  ;;  %v747_v15 = vpop.f32.mrb[0].mxu1 }
 0x19a   : > { %v730_v16 = vadd.f32 %v729_v14, %v728_v12  ;;  %v536_v17 = vpop.f32.mrb[1].mxu1  ;;  %v731_v18 = vpop.f32.mrb[6].mxu0 }
 0x19b   : > { %v537_v19 = vadd.f32 %v536_v17, %v488_v13  ;;  %v732_v20 = vpop.f32.mrb[7].mxu0  ;;  %v748_v21 = vpop.f32.mrb[2].mxu1 }
 0x19c   : > { %v496_v23 = vadd.f32 %v730_v16, %v409_v11  ;;  %v733_v24 = vadd.f32 %v732_v20, %v731_v18  ;;  %v539_v25 = vpop.f32.mrb[3].mxu1 }
 0x19d   : > { %v540_v27 = vadd.f32 %v539_v25, %v491_v22  ;;  %v551_v30 = vmax.f32 %v537_v19, 0.0 }
 0x19e   : > { %v545_v28 = vadd.f32 %v747_v15, %v496_v23  ;;  %v499_v29 = vadd.f32 %v733_v24, %v414_v26 }
 0x19f   : > { %v552_v31 = vmax.f32 %v540_v27, 0.0 }
 0x1a0   : > { %v548_v32 = vadd.f32 %v748_v21, %v499_v29  ;;  %v553_v34 = vmax.f32 %v545_v28, 0.0 }
 0x1a1   : > { %v555_v33 = vpack.c.bf16 %v552_v31, %v551_v30 }
 0x1a2   : > { %v554_v35 = vmax.f32 %v548_v32, 0.0 }
 0x1a3   : > { %750 = vmatpush3.bf16.msra.mxu1 %v555_v33 }
 0x1a4   : > { %v556_v36 = vpack.c.bf16 %v554_v35, %v553_v34  ;;  %751 = vmatprep.subr.bf16.mxu1 %v843_v2 }
 0x1a7   : > { %752 = vmatpush3.bf16.msra.mxu1 %v556_v36 }
 0x1aa   : > { %754 = vmatmul.mubr.msk.bf16.vlgmr.msra.gmra.mrb[4].mxu1 %vm446_vm0, %v557_v37 }
 0x27d   : > { %v601_v39 = vpop.f32.mrb[4].mxu1 }
 0x27e   : > { %v602_v40 = vadd.f32 %v601_v39, %v562_v38  ;;  %v755_v41 = vpop.f32.mrb[5].mxu1 }
 0x27f   : > { %v604_v42 = vpop.f32.mrb[6].mxu1 }
 0x280   : > { %v607_v43 = vpack.c.bf16 %v602_v40, %v602_v40  ;;  %v756_v44 = vpop.f32.mrb[7].mxu1 }
 0x282   : > { %608 = vst [vmem:[%s242_s15] sm:$0xf] %v607_v43 }
 0x283 PF: > { %s15_s20 = sadd.s32 1, %s832_s20   ;;  %s965_s18 = smov %s828_s19 }
 0x284   : > { %p12_p5 = scmp.ge.s32.totalorder %s15_s20, 4   ;;  %s966_s19 = smov %s968_s21 }
 0x286   :  { %14 = sbr.rel (!%p12_p5) target bundleno = 2 (0x2), region = 70 }

// kernel: deeplabv3_forward.7
= control target key start
LH: loop header
LB: loop body
LE: loop exit
PB: predicated region body
PF: predicated region fallthrough
CT: control target
= control target key end

     0   :  { %8 = vsyncpa [#allocation3], 0  ;;  %s1166_s0 = inlined_call_operand.vmem [shape: bf16[2,8,4,4], index: 0, kind: input, shape index: {}]   ;;  %s1167_s1 = inlined_call_operand.vmem [shape: bf16[16,4], index: 1, kind: input, shape index: {}]   ;;  %s1168_s2 = inlined_call_operand.vmem [shape: bf16[4,16], index: 2, kind: input, shape index: {}]   ;;  %s1169_s3 = inlined_call_operand.hbm [shape: f32[2,8,16,16], index: 3, kind: output, shape index: {}]  }
   0x1   :  { %10 = vsyncpa [#allocation3 + $0x1], 0  ;;  %s990_s12 = smov 0   ;;  %s992_s13 = smov 0  }
   0x2   :  { %s994_s14 = smov 0   ;;  %s996_s15 = smov 0  }
   0x3 LB: > { %s1011_s16 = sadd.s32 4294967295, %s962_s15   ;;  %s756_s17 = sadd.s32 4294967294, %s962_s15   ;;  %s962_s15 = sphi %s996_s15, %s1175_s15   ;;  %s958_s14 = sphi %s994_s14, %s1174_s14   ;;  %s954_s13 = sphi %s992_s13, %s1173_s13   ;;  %s950_s12 = sphi %s990_s12, %s1172_s12  }
   0x4   : > { %s1015_s18 = sadd.s32 1, %s962_s15   ;;  %s91_s19 = sadd.s32 1, %s958_s14 }
   0x5   : > { %s88_s20 = ssub.s32 %s962_s15, %s1015_s18  ;;  %p101_p0 = scmp.ne.s32.totalorder %s958_s14, %s954_s13 }
   0x6   : > { %p89_p1 = scmp.eq.s32.totalorder %s88_s20, 0  ;;  %p102_p2 = scmp.eq.s32.totalorder %s1011_s16, 1 }
   0x7   : > { %p107_p3 = scmp.ne.s32.totalorder %s954_s13, %s950_s12  ;;  %p108_p4 = scmp.eq.s32.totalorder %s756_s17, 1 }
   0x8   : > { %s1026_s21 = scalar_select %p89_p1, %s958_s14, %s91_s19  }
   0x9   : > { %p1028_p5 = por %p102_p2, %p101_p0  ;;  %p1032_p6 = por %p108_p4, %p107_p3 }
   0xa   : > { %p759_p7 = scmp.ge.s32.totalorder %s962_s15, 1  ;;  %p140_p8 = scmp.lt.s32.totalorder %s962_s15, 3 }
   0xc   : > { %p141_p9 = pnand %p759_p7, %p140_p8 }
   0xd   : > { %v178_v0 = vld [vmem:[%s1168_s2] sm:$0x3] (!%p141_p9)  ;;  %vm228_vm0 = vcmask (!%p141_p9), 1041408   ;;  %p164_p10 = scmp.lt.s32.totalorder (!%p141_p9), %s1011_s16, 1  ;;  %v192_v1 = vlaneseq (!%p141_p9)  ;;  %v964_v3 = vmov (!%p141_p9), 1983009808  }
   0xe   : > { %144 = sbr.rel (%p141_p9) target bundleno = 508 (0x1fc), region = 32  ;;  %854 = vmatprep.subr.msk.bf16.mxu0 (!%p141_p9), %vm228_vm0, %v178_v0  ;;  %v230_v2 = vsel (!%p141_p9), %vm228_vm0, %v178_v0, 0  ;;  %v190_v4 = vunpack.c.l.s4 (!%p141_p9), %v964_v3  ;;  %vm221_vm1 = vcmask (!%p141_p9), 31744   ;;  %v965_v26 = vmov (!%p141_p9), 0.0   ;;  %v899_v37 = vld [vmem:[%s1167_s1] sm:$0xff] (!%p141_p9)   ;;  %s161_s6 = sand.u32 (!%p141_p9), 1, %s954_s13  }
   0xf   : > { %801 = vmatpush3.bf16.msra.mxu0 (!%p141_p9), %v230_v2  ;;  %v193_v5 = vshrl.u32 (!%p141_p9), %v192_v1, 7  ;;  %806 = vmatprep.subr.bf16.mxu1 (!%p141_p9), %v965_v26  ;;  %vm966_vm2 = vmmov (!%p141_p9), 0   ;;  %s760_s7 = sshll.u32 (!%p141_p9), %s161_s6, 7  ;;  %vm663_vm3 = vcmask (!%p141_p9), 130048   ;;  %s780_s9 = sshll.u32 (!%p141_p9), %s1011_s16, 11 }
  0x10   : > { %v191_v6 = vunpack.c.0.s8 (!%p141_p9), %v190_v4  ;;  %812 = vmatprep.subr.bf16.mxu0 (!%p141_p9), %v965_v26  ;;  %808 = vmatprep.mubr.msk.bf16.mxu1 (!%p141_p9), %vm966_vm2, %v965_v26  ;;  %s1080_s8 = scalar_lea.vmem (!%p141_p9), [#allocation2], %s760_s7  ;;  %s1113_s19 = scalar_lea.hbm (!%p141_p9), %s1169_s3, %s780_s9 }
  0x11   : > { %s694_s10 = sshll.u32 (!%p141_p9), %s1080_s8, 4  ;;  %s967_s24 = smov (!%p141_p9), [#allocation2]   ;;  %s1115_s10 = int_to_ptr.vmem [resolvable:$true] %s694_s10 }
  0x12   : > { %v194_v7 = vsub.s32 (!%p141_p9), %v191_v6, %v193_v5  ;;  %s900_s20 = scalar_lea.vmem (!%p141_p9), %s1115_s10, 2048  ;;  %s904_s25 = sshll.u32 (!%p141_p9), %s967_s24, 4  ;;  %s905_s25 = int_to_ptr.vmem [resolvable:$false] %s904_s25 }
  0x13   : > { %p901_p11 = scmp.ne.s32.totalorder (!%p141_p9), %s1115_s10, %s900_s20  ;;  %p907_p0 = scmp.lt.s32.totalorder (!%p141_p9), %s1115_s10, %s905_s25 }
  0x15   : > { %s165_s26 = scalar_select %p164_p10, %s1011_s16, 1 }
  0x16   : > { %s1125_s16 = scalar_lea.sflag [#allocation3], %s161_s6  ;;  %p902_p12 = pnand %p901_p11, %p1028_p5 }
  0x17   : > { %s779_s27 = sshll.u32 %s165_s26, 4  ;;  %s906_s26 = scalar_lea.vmem %s905_s25, 4096 }
  0x18   : > { %s168_s30 = scalar_lea.vmem %s1166_s0, %s779_s27  ;;  %p903_p13 = pneg %p902_p12 }
  0x19   : > { %v170_v8 = vld [vmem:[%s168_s30] sm:$0x3]  ;;  %v171_v9 = vld [vmem:[%s168_s30 + $0x2] sm:$0x3]  ;;  %v172_v10 = vld [vmem:[%s168_s30 + $0x4] sm:$0x3]  ;;  %p908_p1 = scmp.lt.s32.totalorder %s906_s26, %s900_s20 }
  0x1a   : > { %v173_v11 = vld [vmem:[%s168_s30 + $0x6] sm:$0x3]  ;;  %v187_v12 = vcombine.low %v170_v8, %v171_v9  ;;  %v174_v13 = vld [vmem:[%s168_s30 + $0x8] sm:$0x3]  ;;  %v175_v14 = vld [vmem:[%s168_s30 + $0xa] sm:$0x3] }
  0x1b   : > { %v188_v15 = vcombine.low %v172_v10, %v173_v11  ;;  %v176_v16 = vld [vmem:[%s168_s30 + $0xc] sm:$0x3]  ;;  %v177_v17 = vld [vmem:[%s168_s30 + $0xe] sm:$0x3]  ;;  %v204_v18 = vcombine.low %v174_v13, %v175_v14  ;;  %p909_p2 = por %p908_p1, %p907_p0 }
  0x1c   : > { %v195_v19 = vrot.slane %v187_v12, %v194_v7  ;;  %v205_v20 = vcombine.low %v176_v16, %v177_v17 }
  0x1d   : > { %v202_v21 = vrot.slane %v188_v15, %v194_v7  ;;  %v212_v22 = vrot.slane %v204_v18, %v194_v7  ;;  %p910_p3 = pnand %p909_p2, %p903_p13 }
  0x1e   : > { %v219_v23 = vrot.slane %v205_v20, %v194_v7 }
  0x1f   : > { %v203_v24 = vcombine.low %v195_v19, %v202_v21 }
  0x20   : > { %v220_v25 = vcombine.low %v212_v22, %v219_v23 }
  0x21   : > { %802 = vmatprep.mubr.msk.bf16.mxu0 %vm221_vm1, %v203_v24 }
  0x22   : > { %803 = vmatmul.mubr.msk.bf16.vlgmr.msra.gmra.mrb[0].mxu0 %vm221_vm1, %v220_v25 }
  0x23   : > { %814 = vmatprep.mubr.msk.bf16.mxu0 %vm966_vm2, %v965_v26 }
  0xf5   : > { %v804_v27 = vpop.f32.mrb[0].mxu0 }
  0xf6   : > { %v266_v28 = vpop.f32.mrb[1].mxu0  ;;  %v287_v41 = vcombine.high %v804_v27, %v804_v27  ;;  %v297_v43 = vpack.c.bf16 %v804_v27, %v804_v27 }
  0xf7   : > { %v285_v29 = vcombine.high %v266_v28, %v266_v28  ;;  %v293_v30 = vpack.c.bf16 %v266_v28, %v266_v28  ;;  %v805_v31 = vpop.f32.mrb[2].mxu0 }
  0xf8   : > { %v269_v32 = vpop.f32.mrb[3].mxu0  ;;  %v298_v44 = vpack.c.bf16 %v287_v41, %v287_v41  ;;  %v488_v45 = vsel %vm228_vm0, %v297_v43, 0  ;;  %v288_v46 = vcombine.high %v805_v31, %v805_v31  ;;  %v299_v48 = vpack.c.bf16 %v805_v31, %v805_v31 }
  0xf9   : > { %v294_v33 = vpack.c.bf16 %v285_v29, %v285_v29  ;;  %v286_v34 = vcombine.high %v269_v32, %v269_v32  ;;  %v295_v35 = vpack.c.bf16 %v269_v32, %v269_v32  ;;  %v312_v36 = vsel %vm228_vm0, %v293_v30, 0 }
  0xfa   : > { %807 = vmatpush3.bf16.msra.mxu1 %v312_v36  ;;  %v532_v47 = vsel %vm228_vm0, %v298_v44, 0  ;;  %v300_v49 = vpack.c.bf16 %v288_v46, %v288_v46  ;;  %v576_v50 = vsel %vm228_vm0, %v299_v48, 0 }
  0xfb   : > { %v296_v38 = vpack.c.bf16 %v286_v34, %v286_v34  ;;  %v356_v39 = vsel %vm228_vm0, %v294_v33, 0  ;;  %818 = vmatprep.subr.bf16.mxu1 %v965_v26  ;;  %v400_v40 = vsel %vm228_vm0, %v295_v35, 0 }
  0xfc   : > { %813 = vmatpush3.bf16.msra.mxu0 %v356_v39  ;;  %v620_v51 = vsel %vm228_vm0, %v300_v49, 0 }
  0xfd   : > { %809 = vmatmul.mubr.msk.bf16.vlgmr.msra.gmra.mrb[0].mxu1 %vm221_vm1, %v899_v37  ;;  %824 = vmatprep.subr.bf16.mxu0 %v965_v26  ;;  %v444_v42 = vsel %vm228_vm0, %v296_v38, 0 }
  0xfe   : > { %819 = vmatpush3.bf16.msra.mxu1 %v400_v40  ;;  %820 = vmatprep.mubr.msk.bf16.mxu1 %vm966_vm2, %v965_v26 }
  0xff   : > { %815 = vmatmul.mubr.msk.bf16.vlgmr.msra.gmra.mrb[4].mxu0 %vm221_vm1, %v899_v37  ;;  %830 = vmatprep.subr.bf16.mxu1 %v965_v26 }
 0x100   : > { %825 = vmatpush3.bf16.msra.mxu0 %v444_v42  ;;  %826 = vmatprep.mubr.msk.bf16.mxu0 %vm966_vm2, %v965_v26 }
 0x101   : > { %836 = vmatprep.subr.bf16.mxu0 %v965_v26 }
 0x105   : > { %821 = vmatmul.mubr.msk.bf16.vlgmr.msra.gmra.mrb[4].mxu1 %vm221_vm1, %v899_v37 }
 0x106   : > { %831 = vmatpush3.bf16.msra.mxu1 %v488_v45  ;;  %832 = vmatprep.mubr.msk.bf16.mxu1 %vm966_vm2, %v965_v26 }
 0x107   : > { %827 = vmatmul.mubr.msk.bf16.vlgmr.msra.gmra.mrb[8].mxu0 %vm221_vm1, %v899_v37  ;;  %842 = vmatprep.subr.bf16.mxu1 %v965_v26 }
 0x108   : > { %837 = vmatpush3.bf16.msra.mxu0 %v532_v47  ;;  %838 = vmatprep.mubr.msk.bf16.mxu0 %vm966_vm2, %v965_v26 }
 0x109   : > { %848 = vmatprep.subr.bf16.mxu0 %v965_v26 }
 0x10d   : > { %833 = vmatmul.mubr.msk.bf16.vlgmr.msra.gmra.mrb[8].mxu1 %vm221_vm1, %v899_v37 }
 0x10e   : > { %843 = vmatpush3.bf16.msra.mxu1 %v576_v50  ;;  %844 = vmatprep.mubr.msk.bf16.mxu1 %vm966_vm2, %v965_v26 }
 0x10f   : > { %839 = vmatmul.mubr.msk.bf16.vlgmr.msra.gmra.mrb[12].mxu0 %vm221_vm1, %v899_v37 }
 0x110   : > { %849 = vmatpush3.bf16.msra.mxu0 %v620_v51  ;;  %850 = vmatprep.mubr.msk.bf16.mxu0 %vm966_vm2, %v965_v26 }
 0x115   : > { %845 = vmatmul.mubr.msk.bf16.vlgmr.msra.gmra.mrb[12].mxu1 %vm221_vm1, %v899_v37 }
 0x117   : > { %851 = vmatmul.mubr.msk.bf16.vlgmr.msra.gmra.mrb[16].mxu0 %vm221_vm1, %v899_v37 }
 0x1d0   : > { %v348_v52 = vpop.f32.mrb[0].mxu1 }
 0x1d1   : > { %664 = vst.msk [vmem:[%s1080_s8] sm:$0xff] %vm663_vm3, %v348_v52  ;;  %v810_v53 = vpop.f32.mrb[1].mxu1 }
 0x1d2   : > { %v392_v54 = vpop.f32.mrb[4].mxu0  ;;  %v351_v55 = vpop.f32.mrb[2].mxu1 }
 0x1d3   : > { %666 = vst.msk [vmem:[%s1080_s8 + $0x10] sm:$0xff] %vm663_vm3, %v392_v54  ;;  %v816_v56 = vpop.f32.mrb[5].mxu0  ;;  %665 = vst.msk [vmem:[%s1080_s8 + $0x8] sm:$0xff] %vm663_vm3, %v351_v55  ;;  %v811_v57 = vpop.f32.mrb[3].mxu1 }
 0x1d4   : > { %v395_v58 = vpop.f32.mrb[6].mxu0 }
 0x1d5   : > { %667 = vst.msk [vmem:[%s1080_s8 + $0x18] sm:$0xff] %vm663_vm3, %v395_v58  ;;  %v817_v59 = vpop.f32.mrb[7].mxu0 }
 0x1d8   : > { %v436_v60 = vpop.f32.mrb[4].mxu1 }
 0x1d9   : > { %668 = vst.msk [vmem:[%s1080_s8 + $0x20] sm:$0xff] %vm663_vm3, %v436_v60  ;;  %v822_v61 = vpop.f32.mrb[5].mxu1 }
 0x1da   : > { %v480_v62 = vpop.f32.mrb[8].mxu0  ;;  %v439_v63 = vpop.f32.mrb[6].mxu1 }
 0x1db   : > { %670 = vst.msk [vmem:[%s1080_s8 + $0x30] sm:$0xff] %vm663_vm3, %v480_v62  ;;  %v828_v0 = vpop.f32.mrb[9].mxu0  ;;  %669 = vst.msk [vmem:[%s1080_s8 + $0x28] sm:$0xff] %vm663_vm3, %v439_v63  ;;  %v823_v1 = vpop.f32.mrb[7].mxu1 }
 0x1dc   : > { %v483_v2 = vpop.f32.mrb[10].mxu0 }
 0x1dd   : > { %671 = vst.msk [vmem:[%s1080_s8 + $0x38] sm:$0xff] %vm663_vm3, %v483_v2  ;;  %v829_v3 = vpop.f32.mrb[11].mxu0 }
 0x1e0   : > { %v524_v4 = vpop.f32.mrb[8].mxu1 }
 0x1e1   : > { %672 = vst.msk [vmem:[%s1080_s8 + $0x40] sm:$0xff] %vm663_vm3, %v524_v4  ;;  %v834_v5 = vpop.f32.mrb[9].mxu1 }
 0x1e2   : > { %v568_v6 = vpop.f32.mrb[12].mxu0  ;;  %v527_v7 = vpop.f32.mrb[10].mxu1 }
 0x1e3   : > { %674 = vst.msk [vmem:[%s1080_s8 + $0x50] sm:$0xff] %vm663_vm3, %v568_v6  ;;  %v840_v8 = vpop.f32.mrb[13].mxu0  ;;  %673 = vst.msk [vmem:[%s1080_s8 + $0x48] sm:$0xff] %vm663_vm3, %v527_v7  ;;  %v835_v9 = vpop.f32.mrb[11].mxu1 }
 0x1e4   : > { %v571_v10 = vpop.f32.mrb[14].mxu0 }
 0x1e5   : > { %675 = vst.msk [vmem:[%s1080_s8 + $0x58] sm:$0xff] %vm663_vm3, %v571_v10  ;;  %v841_v11 = vpop.f32.mrb[15].mxu0 }
 0x1e8   : > { %v612_v12 = vpop.f32.mrb[12].mxu1 }
 0x1e9   : > { %676 = vst.msk [vmem:[%s1080_s8 + $0x60] sm:$0xff] %vm663_vm3, %v612_v12  ;;  %v846_v13 = vpop.f32.mrb[13].mxu1 }
 0x1ea   : > { %v656_v14 = vpop.f32.mrb[16].mxu0  ;;  %v615_v15 = vpop.f32.mrb[14].mxu1 }
 0x1eb   : > { %678 = vst.msk [vmem:[%s1080_s8 + $0x70] sm:$0xff] %vm663_vm3, %v656_v14  ;;  %v852_v16 = vpop.f32.mrb[17].mxu0  ;;  %677 = vst.msk [vmem:[%s1080_s8 + $0x68] sm:$0xff] %vm663_vm3, %v615_v15  ;;  %v847_v17 = vpop.f32.mrb[15].mxu1 }
 0x1ec   : > { %v659_v18 = vpop.f32.mrb[18].mxu0 }
 0x1ed   : > { %679 = vst.msk [vmem:[%s1080_s8 + $0x78] sm:$0xff] %vm663_vm3, %v659_v18  ;;  %v853_v19 = vpop.f32.mrb[19].mxu0 }
 0x1ee   : > { %913 = shalt.err (!%p910_p3)
}
 0x1ef   : > { %s914_s27 = scalar_lea.hbm %s1113_s19, 2048  ;;  %s918_s30 = scalar_lea.hbm %s1169_s3, 4096 }
 0x1f0   : > { %p915_p4 = scmp.ne.s32.totalorder %s1113_s19, %s914_s27  ;;  %p919_p9 = scmp.lt.u32.totalorder %s1113_s19, %s1169_s3 }
 0x1f1   : > { %p920_p10 = scmp.lt.u32.totalorder %s918_s30, %s914_s27  ;;  %p922_p12 = scmp.lt.u32.totalorder %s914_s27, %s1113_s19 }
 0x1f2   : > { %p916_p7 = pnand %p915_p4, %p1028_p5 }
 0x1f3   : > { %p921_p11 = por %p920_p10, %p919_p9 }
 0x1f4   : > { %p917_p8 = pneg %p916_p7 }
 0x1f5   : > { %p923_p13 = por %p922_p12, %p921_p11 }
 0x1f7   : > { %p924_p0 = pnand %p923_p13, %p917_p8 }
 0x1f9   : > { %927 = shalt.err (!%p924_p0)
}
 0x1fa   : > { %s968_s6 = smov 128   ;;  %s969_s7 = smov 8  }
 0x1fb   : > { %855 = dma.vmem_to_hbm [thread:$0]  (%p1028_p5), %s1115_s10, 2048, %s1113_s19, %s1125_s16, %s968_s6, %s968_s6, %s969_s7  }
 0x1fc PF: > { %p861_p1 = scmp.ge.s32.totalorder %s962_s15, 2  ;;  %s709_s8 = sand.u32 1, %s950_s12  }
 0x1fd   : > { %s710_s9 = scalar_lea.sflag [#allocation3], %s709_s8 }
 0x1fe   : > { %p858_p2 = pnand %p861_p1, %p1032_p6 }
 0x200   : > { %945 = dma.done.wait (!%p858_p2), %s710_s9, 2048  }
 0x201   : > { %947 = vsyncadd (!%p858_p2), %s710_s9, 4294965248  ;;  %p13_p3 = scmp.ge.s32.totalorder %s1015_s18, 4   ;;  %s1172_s12 = smov %s954_s13 }
 0x202   : > { %s1173_s13 = smov %s958_s14  ;;  %s1174_s14 = smov %s1026_s21 }
 0x203   : > { %s1175_s15 = smov %s1015_s18  ;;  %15 = sbr.rel (!%p13_p3) target bundleno = 3 (0x3), region = 67 }
 0x20a   :  { %715 = vsyncpa [#allocation3], 1 }
 0x20b   :  { %717 = vsyncpa [#allocation3 + $0x1], 1 }

</bundles_post_ra>
